<compile_context>
chip_gen: v5e
topology: v5e:2x2
jax: 0.10.0
libtpu: 0.0.40
codegen_flags: <defaults>
</compile_context>

<pallas_src>
import jax
import jax.numpy as jnp
from jax.experimental import pallas as pl
from jax.experimental.pallas import tpu as pltpu


def attn_net_kernel(x_ref, w1_ref, b1_ref, w2_ref, b2_ref, out_ref):
    # First Linear: cast x / w1 to bf16 on the VPU right before the MXU matmul
    # (x streams through HBM exactly once, as f32); accumulate in f32.
    x = x_ref[...].astype(jnp.bfloat16)                    # (TILE_N, D)
    w1 = w1_ref[...].astype(jnp.bfloat16)                  # (D, H)
    hpre = jnp.dot(x, w1, preferred_element_type=jnp.float32) + b1_ref[...]

    # Tanh in the epilogue dtype (bf16 on v6e/v7x where EUP/VPU have bf16
    # paths, f32 elsewhere).  Dropout(p=0.0) is the identity.
    w2 = w2_ref[...]                                       # (1, H), epilogue dtype
    hidden = jnp.tanh(hpre.astype(w2.dtype))               # (TILE_N, H)

    # Second Linear (H -> 1), arranged as an NT matmul so each row's scalar
    # lands lane-dense in a (1, TILE_N) block: unmasked full-lane stores on
    # writeback instead of masked 1-lane stores.
    att = jnp.einsum("oh,nh->on", w2, hidden,
                     preferred_element_type=jnp.float32)   # (1, TILE_N) f32

    out_ref[...] = (att + b2_ref[0, 0]).astype(out_ref.dtype)


def attn_net_forward(x, w1, b1, w2, b2, *, tile_n=None, bf16_epilogue=None):
    """Attn_Net forward: (N, D) -> (N, 1).

    x : (N, D)        input features
    w1: (D, H)        first Linear weight, pre-transposed to (in, out)
    b1: (H,) / (1,H)  first Linear bias
    w2: (H, 1)        second Linear weight, pre-transposed to (in, out)
    b2: scalar-like   second Linear bias
    """
    n, d = x.shape
    hdim = w1.shape[1]

    if bf16_epilogue is None:
        # bf16 tanh/VPU epilogue helps on v6e/v7x; no bf16 EUP/VPU on v5e and
        # older, so keep those in f32 (correct either way, this is perf only).
        kind = jax.devices()[0].device_kind.lower()
        bf16_epilogue = not any(v in kind for v in ("v2", "v3", "v4", "v5"))
    ep_dtype = jnp.bfloat16 if bf16_epilogue else jnp.float32

    # Weights/biases are tiny; reshape (and cast w2 to the epilogue dtype) once.
    b1_r = b1.astype(jnp.float32).reshape(1, hdim)
    w2_r = w2.astype(ep_dtype).reshape(1, hdim)    # row layout for the NT matmul
    b2_r = b2.astype(jnp.float32).reshape(1, 1)    # SMEM scalar

    # Tile over N.  Rules:
    #   * lane-dense output blocks (1, tile_n) need tile_n % 128 == 0 unless a
    #     single block spans all of N,
    #   * >= 2 grid steps when N allows, so both v7x TensorCores get work,
    #   * large tiles (<= 1024) amortize the ~0.35us per-grid-step overhead;
    #     VMEM stays small (x tile is tile_n*D*4 B, double-buffered), well
    #     under even v5e's 16 MiB scoped default for moderate D.
    if tile_n is None:
        if n < 256:
            tile_n = n
        else:
            tile_n = min(1024, ((pl.cdiv(n, 2) + 127) // 128) * 128)
    grid = (pl.cdiv(n, tile_n),)

    ep_bytes = 2 if bf16_epilogue else 4
    cost = pl.CostEstimate(
        flops=2 * n * d * hdim + 2 * n * hdim,
        transcendentals=n * hdim,
        bytes_accessed=(n * d * 4 + d * hdim * 4 + hdim * 4
                        + hdim * ep_bytes + 4 + n * 4),
    )

    def _call(const_kw):
        in_specs = [
            pl.BlockSpec((tile_n, d), lambda i: (i, 0)),              # x streams over N
            pl.BlockSpec((d, hdim), lambda i: (0, 0), **const_kw),    # w1 VMEM-resident
            pl.BlockSpec((1, hdim), lambda i: (0, 0), **const_kw),    # b1
            pl.BlockSpec((1, hdim), lambda i: (0, 0), **const_kw),    # w2 (row layout)
            pl.BlockSpec(memory_space=pltpu.MemorySpace.SMEM),        # b2 scalar
        ]
        return pl.pallas_call(
            attn_net_kernel,
            out_shape=jax.ShapeDtypeStruct((1, n), jnp.float32),
            grid=grid,
            in_specs=in_specs,
            out_specs=pl.BlockSpec((1, tile_n), lambda i: (0, i)),    # lane-dense
            compiler_params=pltpu.CompilerParams(
                # Shard the row grid across both TensorCores on v7x.
                # (vmem_limit_bytes left at default: usage here is a few MiB;
                #  raise it only when sweeping tile_n upward with large D.)
                dimension_semantics=("parallel",),
            ),
            cost_estimate=cost,
        )(x, w1, b1_r, w2_r, b2_r)

    if hasattr(pl, "Buffered"):
        try:
            # Constant-index operands never change block index -> a single VMEM
            # buffer suffices (halves their footprint; matters on v7x's 64 MiB
            # VMEM when D*H is large).
            out_row = _call(dict(pipeline_mode=pl.Buffered(1)))
        except Exception:  # pragma: no cover - jax build rejects Buffered(1)
            out_row = _call({})
    else:  # pragma: no cover - very old jax
        out_row = _call({})

    return out_row.reshape(n, 1)


if __name__ == "__main__":
    # Module default hidden_dim=256; small N / input_dim. Default tiling gives
    # tile_n=256 -> a 2-step pipelined grid (the second block is row-padded).
    N, INPUT_DIM, HIDDEN_DIM = 384, 64, 256

    key = jax.random.PRNGKey(0)
    kx, kw1, kb1, kw2, kb2 = jax.random.split(key, 5)

    x = jax.random.normal(kx, (N, INPUT_DIM), dtype=jnp.float32)

    # PyTorch nn.Linear stores (out, in); kept pre-transposed to (in, out) here.
    lim1 = 1.0 / (INPUT_DIM ** 0.5)
    w1 = jax.random.uniform(kw1, (INPUT_DIM, HIDDEN_DIM), jnp.float32, -lim1, lim1)
    b1 = jax.random.uniform(kb1, (HIDDEN_DIM,), jnp.float32, -lim1, lim1)
    lim2 = 1.0 / (HIDDEN_DIM ** 0.5)
    w2 = jax.random.uniform(kw2, (HIDDEN_DIM, 1), jnp.float32, -lim2, lim2)
    b2 = jax.random.uniform(kb2, (1, 1), jnp.float32, -lim2, lim2)

    out = attn_net_forward(x, w1, b1, w2, b2)
    out = jax.block_until_ready(out)
    assert out.shape == (N, 1)

    # Model-parity check vs. the exact f32 math of the PyTorch module
    # (Linear -> Tanh -> Dropout(0) -> Linear).  Loose tolerance: the kernel
    # runs the matmul inputs (and, on v6e/v7x, the epilogue) in bf16.
    ref_f32 = jnp.tanh(x @ w1 + b1[None, :]) @ w2 + b2
    assert jnp.allclose(out, ref_f32, atol=7e-2, rtol=7e-2), float(
        jnp.max(jnp.abs(out - ref_f32)))

    # Tighter check vs. a reference with the same bf16 quantization of x / w1
    # (remaining delta is only the epilogue precision).
    xq = x.astype(jnp.bfloat16).astype(jnp.float32)
    w1q = w1.astype(jnp.bfloat16).astype(jnp.float32)
    ref_q = jnp.tanh(xq @ w1q + b1[None, :]) @ w2 + b2
    assert jnp.allclose(out, ref_q, atol=3e-2, rtol=3e-2), float(
        jnp.max(jnp.abs(out - ref_q)))

    # Ragged-N path with an explicit tile: exercises the padded last x block
    # and the masked partial writeback of the final (1, tile_n) output block.
    N2, D2 = 200, 96
    x2 = jax.random.normal(jax.random.split(key, 2)[1], (N2, D2), dtype=jnp.float32)
    lim = 1.0 / (D2 ** 0.5)
    w1b = jax.random.uniform(kw1, (D2, HIDDEN_DIM), jnp.float32, -lim, lim)
    out2 = jax.block_until_ready(attn_net_forward(x2, w1b, b1, w2, b2, tile_n=128))
    ref2 = jnp.tanh(x2 @ w1b + b1[None, :]) @ w2 + b2
    assert out2.shape == (N2, 1)
    assert jnp.allclose(out2, ref2, atol=7e-2, rtol=7e-2), float(
        jnp.max(jnp.abs(out2 - ref2)))

    print("KERNEL_OK")
</pallas_src>

<mosaic_0001>
module attributes {stable_mosaic.version = 11 : i64} {
  func.func @attn_net_kernel(%arg0: i32, %arg1: memref<256x64xf32, #tpu.memory_space<vmem>>, %arg2: memref<64x256xf32, #tpu.memory_space<vmem>>, %arg3: memref<1x256xf32, #tpu.memory_space<vmem>>, %arg4: memref<1x256xbf16, #tpu.memory_space<vmem>>, %arg5: memref<1x1xf32, #tpu.memory_space<smem>>, %arg6: memref<1x256xf32, #tpu.memory_space<vmem>>) attributes {dimension_semantics = [#tpu.dimension_semantics<parallel>], iteration_bounds = array<i64: 2>, scalar_prefetch = 0 : i64, scratch_operands = 0 : i64, tpu.core_type = #tpu.core_type<tc>, window_params = [{transform_indices = @transform_0, window_bounds = array<i64: 256, 64>}, {pipeline_mode = #tpu.pipeline_mode<synchronous>, transform_indices = @transform_1, window_bounds = array<i64: 64, 256>}, {pipeline_mode = #tpu.pipeline_mode<synchronous>, transform_indices = @transform_2, window_bounds = array<i64: 1, 256>}, {pipeline_mode = #tpu.pipeline_mode<synchronous>, transform_indices = @transform_3, window_bounds = array<i64: 1, 256>}, {transform_indices = @transform_4, window_bounds = array<i64: 1, 1>}, {transform_indices = @transform_5, window_bounds = array<i64: 1, 256>}]} {
    %c0 = arith.constant 0 : index
    %c0_0 = arith.constant 0 : index
    %0 = vector.load %arg1[%c0, %c0_0] : memref<256x64xf32, #tpu.memory_space<vmem>>, vector<256x64xf32>
    %1 = arith.truncf %0 : vector<256x64xf32> to vector<256x64xbf16>
    %c0_1 = arith.constant 0 : index
    %c0_2 = arith.constant 0 : index
    %2 = vector.load %arg2[%c0_1, %c0_2] : memref<64x256xf32, #tpu.memory_space<vmem>>, vector<64x256xf32>
    %3 = arith.truncf %2 : vector<64x256xf32> to vector<64x256xbf16>
    %cst = arith.constant dense<0.000000e+00> : vector<256x256xf32>
    %4 = tpu.matmul %1, %3, %cst {dimension_numbers = #tpu.dot_dimension_numbers<[1], [0], [0], [1], [0, 0, 1, 1], [], []>} : vector<256x64xbf16>, vector<64x256xbf16>, vector<256x256xf32> -> vector<256x256xf32>
    %c0_3 = arith.constant 0 : index
    %c0_4 = arith.constant 0 : index
    %5 = vector.load %arg3[%c0_3, %c0_4] : memref<1x256xf32, #tpu.memory_space<vmem>>, vector<1x256xf32>
    %6 = vector.broadcast %5 : vector<1x256xf32> to vector<256x256xf32>
    %7 = arith.addf %4, %6 : vector<256x256xf32>
    %c0_5 = arith.constant 0 : index
    %c0_6 = arith.constant 0 : index
    %8 = vector.load %arg4[%c0_5, %c0_6] : memref<1x256xbf16, #tpu.memory_space<vmem>>, vector<1x256xbf16>
    %9 = arith.truncf %7 : vector<256x256xf32> to vector<256x256xbf16>
    %10 = math.tanh %9 : vector<256x256xbf16>
    "tpu.trace_start"() <{level = 10 : i32, message = "oh,nh->on"}> : () -> ()
    %cst_7 = arith.constant dense<0.000000e+00> : vector<1x256xf32>
    %11 = tpu.matmul %8, %10, %cst_7 {dimension_numbers = #tpu.dot_dimension_numbers<[1], [1], [0], [0], [0, 0, 1, 0], [], []>} : vector<1x256xbf16>, vector<256x256xbf16>, vector<1x256xf32> -> vector<1x256xf32>
    "tpu.trace_stop"() : () -> ()
    %c0_8 = arith.constant 0 : index
    %c0_9 = arith.constant 0 : index
    %12 = memref.load %arg5[%c0_8, %c0_9] : memref<1x1xf32, #tpu.memory_space<smem>>
    %13 = vector.broadcast %12 : f32 to vector<1x256xf32>
    %14 = arith.addf %11, %13 : vector<1x256xf32>
    %c0_10 = arith.constant 0 : index
    %c0_11 = arith.constant 0 : index
    %15 = vector.load %arg6[%c0_10, %c0_11] : memref<1x256xf32, #tpu.memory_space<vmem>>, vector<1x256xf32>
    tpu.vector_store %arg6[%c0_10, %c0_11], %14 {strides = array<i32>} : memref<1x256xf32, #tpu.memory_space<vmem>>, vector<1x256xf32>,
    return
  }
  func.func @transform_0(%arg0: i32) -> (i32, i32) {
    %c0_i32 = arith.constant 0 : i32
    %c0_i32_0 = arith.constant 0 : i32
    return %arg0, %c0_i32 : i32, i32
  }
  func.func @transform_1(%arg0: i32) -> (i32, i32) {
    %c0_i32 = arith.constant 0 : i32
    %c0_i32_0 = arith.constant 0 : i32
    %c0_i32_1 = arith.constant 0 : i32
    return %c0_i32, %c0_i32_0 : i32, i32
  }
  func.func @transform_2(%arg0: i32) -> (i32, i32) {
    %c0_i32 = arith.constant 0 : i32
    %c0_i32_0 = arith.constant 0 : i32
    %c0_i32_1 = arith.constant 0 : i32
    return %c0_i32, %c0_i32_0 : i32, i32
  }
  func.func @transform_3(%arg0: i32) -> (i32, i32) {
    %c0_i32 = arith.constant 0 : i32
    %c0_i32_0 = arith.constant 0 : i32
    %c0_i32_1 = arith.constant 0 : i32
    return %c0_i32, %c0_i32_0 : i32, i32
  }
  func.func @transform_4(%arg0: i32) -> (i32, i32) {
    %c0_i32 = arith.constant 0 : i32
    %c0_i32_0 = arith.constant 0 : i32
    %c0_i32_1 = arith.constant 0 : i32
    return %c0_i32, %c0_i32_0 : i32, i32
  }
  func.func @transform_5(%arg0: i32) -> (i32, i32) {
    %c0_i32 = arith.constant 0 : i32
    %c0_i32_0 = arith.constant 0 : i32
    return %c0_i32, %arg0 : i32, i32
  }
}

module attributes {stable_mosaic.version = 11 : i64} {
  func.func @attn_net_kernel(%arg0: i32, %arg1: memref<256x64xf32, #tpu.memory_space<vmem>>, %arg2: memref<64x256xf32, #tpu.memory_space<vmem>>, %arg3: memref<1x256xf32, #tpu.memory_space<vmem>>, %arg4: memref<1x256xbf16, #tpu.memory_space<vmem>>, %arg5: memref<1x1xf32, #tpu.memory_space<smem>>, %arg6: memref<1x256xf32, #tpu.memory_space<vmem>>) attributes {dimension_semantics = [#tpu.dimension_semantics<parallel>], iteration_bounds = array<i64: 2>, scalar_prefetch = 0 : i64, scratch_operands = 0 : i64, tpu.core_type = #tpu.core_type<tc>, window_params = [{transform_indices = @transform_0, window_bounds = array<i64: 256, 64>}, {pipeline_mode = #tpu.pipeline_mode<synchronous>, transform_indices = @transform_1, window_bounds = array<i64: 64, 256>}, {pipeline_mode = #tpu.pipeline_mode<synchronous>, transform_indices = @transform_2, window_bounds = array<i64: 1, 256>}, {pipeline_mode = #tpu.pipeline_mode<synchronous>, transform_indices = @transform_3, window_bounds = array<i64: 1, 256>}, {transform_indices = @transform_4, window_bounds = array<i64: 1, 1>}, {transform_indices = @transform_5, window_bounds = array<i64: 1, 256>}]} {
    %c0 = arith.constant 0 : index
    %c0_0 = arith.constant 0 : index
    %0 = vector.load %arg1[%c0, %c0_0] : memref<256x64xf32, #tpu.memory_space<vmem>>, vector<256x64xf32>
    %1 = arith.truncf %0 : vector<256x64xf32> to vector<256x64xbf16>
    %c0_1 = arith.constant 0 : index
    %c0_2 = arith.constant 0 : index
    %2 = vector.load %arg2[%c0_1, %c0_2] : memref<64x256xf32, #tpu.memory_space<vmem>>, vector<64x256xf32>
    %3 = arith.truncf %2 : vector<64x256xf32> to vector<64x256xbf16>
    %cst = arith.constant dense<0.000000e+00> : vector<256x256xf32>
    %4 = tpu.matmul %1, %3, %cst {dimension_numbers = #tpu.dot_dimension_numbers<[1], [0], [0], [1], [0, 0, 1, 1], [], []>} : vector<256x64xbf16>, vector<64x256xbf16>, vector<256x256xf32> -> vector<256x256xf32>
    %c0_3 = arith.constant 0 : index
    %c0_4 = arith.constant 0 : index
    %5 = vector.load %arg3[%c0_3, %c0_4] : memref<1x256xf32, #tpu.memory_space<vmem>>, vector<1x256xf32>
    %6 = vector.broadcast %5 : vector<1x256xf32> to vector<256x256xf32>
    %7 = arith.addf %4, %6 : vector<256x256xf32>
    %c0_5 = arith.constant 0 : index
    %c0_6 = arith.constant 0 : index
    %8 = vector.load %arg4[%c0_5, %c0_6] : memref<1x256xbf16, #tpu.memory_space<vmem>>, vector<1x256xbf16>
    %9 = arith.truncf %7 : vector<256x256xf32> to vector<256x256xbf16>
    %10 = math.tanh %9 : vector<256x256xbf16>
    "tpu.trace_start"() <{level = 10 : i32, message = "oh,nh->on"}> : () -> ()
    %cst_7 = arith.constant dense<0.000000e+00> : vector<1x256xf32>
    %11 = tpu.matmul %8, %10, %cst_7 {dimension_numbers = #tpu.dot_dimension_numbers<[1], [1], [0], [0], [0, 0, 1, 0], [], []>} : vector<1x256xbf16>, vector<256x256xbf16>, vector<1x256xf32> -> vector<1x256xf32>
    "tpu.trace_stop"() : () -> ()
    %c0_8 = arith.constant 0 : index
    %c0_9 = arith.constant 0 : index
    %12 = memref.load %arg5[%c0_8, %c0_9] : memref<1x1xf32, #tpu.memory_space<smem>>
    %13 = vector.broadcast %12 : f32 to vector<1x256xf32>
    %14 = arith.addf %11, %13 : vector<1x256xf32>
    %c0_10 = arith.constant 0 : index
    %c0_11 = arith.constant 0 : index
    %15 = vector.load %arg6[%c0_10, %c0_11] : memref<1x256xf32, #tpu.memory_space<vmem>>, vector<1x256xf32>
    tpu.vector_store %arg6[%c0_10, %c0_11], %14 {strides = array<i32>} : memref<1x256xf32, #tpu.memory_space<vmem>>, vector<1x256xf32>,
    return
  }
  func.func @transform_0(%arg0: i32) -> (i32, i32) {
    %c0_i32 = arith.constant 0 : i32
    %c0_i32_0 = arith.constant 0 : i32
    return %arg0, %c0_i32 : i32, i32
  }
  func.func @transform_1(%arg0: i32) -> (i32, i32) {
    %c0_i32 = arith.constant 0 : i32
    %c0_i32_0 = arith.constant 0 : i32
    %c0_i32_1 = arith.constant 0 : i32
    return %c0_i32, %c0_i32_0 : i32, i32
  }
  func.func @transform_2(%arg0: i32) -> (i32, i32) {
    %c0_i32 = arith.constant 0 : i32
    %c0_i32_0 = arith.constant 0 : i32
    %c0_i32_1 = arith.constant 0 : i32
    return %c0_i32, %c0_i32_0 : i32, i32
  }
  func.func @transform_3(%arg0: i32) -> (i32, i32) {
    %c0_i32 = arith.constant 0 : i32
    %c0_i32_0 = arith.constant 0 : i32
    %c0_i32_1 = arith.constant 0 : i32
    return %c0_i32, %c0_i32_0 : i32, i32
  }
  func.func @transform_4(%arg0: i32) -> (i32, i32) {
    %c0_i32 = arith.constant 0 : i32
    %c0_i32_0 = arith.constant 0 : i32
    %c0_i32_1 = arith.constant 0 : i32
    return %c0_i32, %c0_i32_0 : i32, i32
  }
  func.func @transform_5(%arg0: i32) -> (i32, i32) {
    %c0_i32 = arith.constant 0 : i32
    %c0_i32_0 = arith.constant 0 : i32
    return %c0_i32, %arg0 : i32, i32
  }
}

</mosaic_0001>

<bundles_post_ra>
// kernel: tpu_custom_call.1
= control target key start
LH: loop header
LB: loop body
LE: loop exit
PB: predicated region body
PF: predicated region fallthrough
CT: control target
= control target key end

     0   :  { %s1639_s0 = inlined_call_operand.vmem [shape: f32[384,64], index: 0, kind: input, shape index: {}]   ;;  %s1640_s1 = inlined_call_operand.vmem [shape: f32[64,256], index: 1, kind: input, shape index: {}]   ;;  %s1641_s2 = inlined_call_operand.vmem [shape: f32[1,256], index: 2, kind: input, shape index: {}]   ;;  %s1642_s3 = inlined_call_operand.vmem [shape: bf16[1,256], index: 3, kind: input, shape index: {}]   ;;  %s1643_s4 = inlined_call_operand.<no memory space> [shape: f32[1,1], index: 4, kind: input, shape index: {}]   ;;  %s1644_s5 = inlined_call_operand.hbm [shape: f32[1,384], index: 5, kind: output, shape index: {}]  }
   0x1   :  { %10 = sst [smem:[#allocation2]] %s1643_s4 }
   0x2   :  { %11 = vsyncpa [#allocation4], 0 }
   0x3   :  { %13 = vsyncpa [#allocation4 + $0x1], 0  ;;  %s1227_s20 = smov 0   ;;  %s1229_s21 = smov 0  }
   0x4   :  { %s1231_s22 = smov 0   ;;  %s1233_s23 = smov 0  }
   0x5 LB: > { %s1248_s4 = sadd.s32 4294967295, %s1191_s23   ;;  %s900_s24 = sadd.s32 4294967294, %s1191_s23   ;;  %s1191_s23 = sphi %s1233_s23, %s1650_s23   ;;  %s1187_s22 = sphi %s1231_s22, %s1649_s22   ;;  %s1183_s21 = sphi %s1229_s21, %s1648_s21   ;;  %s1179_s20 = sphi %s1227_s20, %s1647_s20  }
   0x6   : > { %s1252_s25 = sadd.s32 1, %s1191_s23   ;;  %s136_s26 = sadd.s32 1, %s1187_s22 }
   0x7   : > { %s133_s27 = ssub.s32 %s1191_s23, %s1252_s25  ;;  %p146_p0 = scmp.ne.s32.totalorder %s1187_s22, %s1183_s21 }
   0x8   : > { %p134_p1 = scmp.eq.s32.totalorder %s133_s27, 0  ;;  %p147_p2 = scmp.eq.s32.totalorder %s1248_s4, 1 }
   0x9   : > { %p152_p3 = scmp.ne.s32.totalorder %s1183_s21, %s1179_s20  ;;  %p153_p4 = scmp.eq.s32.totalorder %s900_s24, 1 }
   0xa   : > { %s1263_s28 = scalar_select %p134_p1, %s1187_s22, %s136_s26  }
   0xb   : > { %p1265_p5 = por %p147_p2, %p146_p0  ;;  %p1269_p6 = por %p153_p4, %p152_p3 }
   0xc   : > { %p903_p7 = scmp.ge.s32.totalorder %s1191_s23, 1  ;;  %p200_p8 = scmp.lt.s32.totalorder %s1191_s23, 3 }
   0xe   : > { %p201_p9 = pnand %p903_p7, %p200_p8 }
   0xf   : > { %s905_s12 = sshll.u32 (!%p201_p9), %s1248_s4, 5  ;;  %s229_s14 = sand.u32 (!%p201_p9), 1, %s1183_s21  }
  0x10   : > { %204 = sbr.rel (%p201_p9) target bundleno = 599 (0x257), region = 40  ;;  %p237_p10 = scmp.lt.s32.totalorder (!%p201_p9), %s905_s12, 47 }
  0x11   : > { %s904_s16 = sshll.u32 (!%p201_p9), %s229_s14, 1  ;;  %s1584_s18 = scalar_lea.sflag (!%p201_p9), [#allocation4], %s229_s14 }
  0x12   : > { %s231_s17 = scalar_lea.vmem (!%p201_p9), [#allocation3], %s904_s16 }
  0x15   : > { %v311_v0 = vld [vmem:[%s1640_s1 + $0x60] sm:$0xff]  ;;  %v313_v1 = vld [vmem:[%s1640_s1 + $0x70] sm:$0xff]  ;;  %v312_v2 = vld [vmem:[%s1640_s1 + $0x68] sm:$0xff]  ;;  %s1652_s12 = smov (!%p237_p10, %s905_s12), 47  ;;  %vm329_vm0 = vcmask 523264   ;;  %vm812_vm1 = vcmask 1040384  }
  0x16   : > { %v321_v3 = vpack.c.bf16 %v313_v1, %v311_v0  ;;  %v314_v4 = vld [vmem:[%s1640_s1 + $0x78] sm:$0xff]  ;;  %v307_v5 = vld [vmem:[%s1640_s1 + $0x40] sm:$0xff]  ;;  %v309_v6 = vld [vmem:[%s1640_s1 + $0x50] sm:$0xff]  ;;  %s906_s15 = sshll.u32 %s1652_s12, 3  ;;  %s940_s19 = sshll.u32 (%p1265_p5), %s1248_s4, 1 }
  0x17   : > { %v322_v7 = vpack.c.bf16 %v314_v4, %v312_v2  ;;  %v308_v8 = vld [vmem:[%s1640_s1 + $0x48] sm:$0xff]  ;;  %v310_v9 = vld [vmem:[%s1640_s1 + $0x58] sm:$0xff]  ;;  %v319_v10 = vpack.c.bf16 %v309_v6, %v307_v5  ;;  %v303_v12 = vld [vmem:[%s1640_s1 + $0x20] sm:$0xff]  ;;  %s1321_s27 = scalar_lea.vmem %s1639_s0, %s906_s15  ;;  %s749_s15 = sld [smem:[#allocation2]] }
  0x18   : > { %382 = vmatpush.bf16.msra.mxu0 %v321_v3  ;;  %944 = vmatpush.bf16.msra.mxu2 %v321_v3  ;;  %v320_v11 = vpack.c.bf16 %v310_v9, %v308_v8  ;;  %v305_v13 = vld [vmem:[%s1640_s1 + $0x30] sm:$0xff]  ;;  %v304_v14 = vld [vmem:[%s1640_s1 + $0x28] sm:$0xff]  ;;  %v306_v15 = vld [vmem:[%s1640_s1 + $0x38] sm:$0xff]  ;;  %s829_s24 = ssub.s32 (%p1265_p5), 3, %s940_s19 }
  0x19   : > { %471 = vmatpush.bf16.msra.mxu1 %v322_v7  ;;  %948 = vmatpush.bf16.msra.mxu3 %v322_v7  ;;  %v317_v16 = vpack.c.bf16 %v305_v13, %v303_v12  ;;  %v318_v17 = vpack.c.bf16 %v306_v15, %v304_v14  ;;  %v299_v18 = vld [vmem:[%s1640_s1] sm:$0xff]  ;;  %v301_v19 = vld [vmem:[%s1640_s1 + $0x10] sm:$0xff]  ;;  %v300_v20 = vld [vmem:[%s1640_s1 + $0x8] sm:$0xff]  ;;  %p830_p11 = scmp.lt.s32.totalorder (%p1265_p5), %s829_s24, 2 }
  0x1a   : > { %v302_v21 = vld [vmem:[%s1640_s1 + $0x18] sm:$0xff]  ;;  %v315_v22 = vpack.c.bf16 %v301_v19, %v299_v18  ;;  %v251_v23 = vld [vmem:[%s1321_s27] sm:$0xff]  ;;  %v252_v24 = vld [vmem:[%s1321_s27 + $0x8] sm:$0xff] }
  0x1b   : > { %v316_v25 = vpack.c.bf16 %v302_v21, %v300_v20  ;;  %v283_v26 = vpack.c.bf16 %v252_v24, %v251_v23  ;;  %v253_v27 = vld [vmem:[%s1321_s27 + $0x10] sm:$0xff]  ;;  %v254_v28 = vld [vmem:[%s1321_s27 + $0x18] sm:$0xff]  ;;  %v255_v30 = vld [vmem:[%s1321_s27 + $0x20] sm:$0xff] }
  0x1c   : > { %383 = vmatpush.bf16.msra.mxu0 %v319_v10  ;;  %945 = vmatpush.bf16.msra.mxu2 %v319_v10  ;;  %v284_v29 = vpack.c.bf16 %v254_v28, %v253_v27  ;;  %v256_v31 = vld [vmem:[%s1321_s27 + $0x28] sm:$0xff]  ;;  %v257_v33 = vld [vmem:[%s1321_s27 + $0x30] sm:$0xff]  ;;  %v258_v34 = vld [vmem:[%s1321_s27 + $0x38] sm:$0xff] }
  0x1d   : > { %472 = vmatpush.bf16.msra.mxu1 %v320_v11  ;;  %949 = vmatpush.bf16.msra.mxu3 %v320_v11  ;;  %v285_v32 = vpack.c.bf16 %v256_v31, %v255_v30  ;;  %v286_v35 = vpack.c.bf16 %v258_v34, %v257_v33  ;;  %v273_v36 = vld [vmem:[%s1321_s27 + $0xb0] sm:$0xff]  ;;  %v274_v37 = vld [vmem:[%s1321_s27 + $0xb8] sm:$0xff]  ;;  %v259_v39 = vld [vmem:[%s1321_s27 + $0x40] sm:$0xff] }
  0x1e   : > { %v1347_v38 = vpack.c.bf16 %v274_v37, %v273_v36  ;;  %v260_v40 = vld [vmem:[%s1321_s27 + $0x48] sm:$0xff]  ;;  %v275_v42 = vld [vmem:[%s1321_s27 + $0xc0] sm:$0xff]  ;;  %v261_v45 = vld [vmem:[%s1321_s27 + $0x50] sm:$0xff] }
  0x1f   : > { %v287_v41 = vpack.c.bf16 %v260_v40, %v259_v39  ;;  %v276_v43 = vld [vmem:[%s1321_s27 + $0xc8] sm:$0xff]  ;;  %v262_v46 = vld [vmem:[%s1321_s27 + $0x58] sm:$0xff]  ;;  %v277_v48 = vld [vmem:[%s1321_s27 + $0xd0] sm:$0xff] }
  0x20   : > { %384 = vmatpush.bf16.msra.mxu0 %v317_v16  ;;  %946 = vmatpush.bf16.msra.mxu2 %v317_v16  ;;  %v295_v44 = vpack.c.bf16 %v276_v43, %v275_v42  ;;  %v288_v47 = vpack.c.bf16 %v262_v46, %v261_v45  ;;  %v278_v49 = vld [vmem:[%s1321_s27 + $0xd8] sm:$0xff]  ;;  %v263_v51 = vld [vmem:[%s1321_s27 + $0x60] sm:$0xff]  ;;  %v264_v52 = vld [vmem:[%s1321_s27 + $0x68] sm:$0xff] }
  0x21   : > { %473 = vmatpush.bf16.msra.mxu1 %v318_v17  ;;  %950 = vmatpush.bf16.msra.mxu3 %v318_v17  ;;  %v296_v50 = vpack.c.bf16 %v278_v49, %v277_v48  ;;  %v289_v53 = vpack.c.bf16 %v264_v52, %v263_v51  ;;  %v265_v54 = vld [vmem:[%s1321_s27 + $0x70] sm:$0xff]  ;;  %v266_v55 = vld [vmem:[%s1321_s27 + $0x78] sm:$0xff]  ;;  %v279_v56 = vld [vmem:[%s1321_s27 + $0xe0] sm:$0xff] }
  0x22   : > { %v280_v57 = vld [vmem:[%s1321_s27 + $0xe8] sm:$0xff]  ;;  %v290_v58 = vpack.c.bf16 %v266_v55, %v265_v54  ;;  %v267_v60 = vld [vmem:[%s1321_s27 + $0x80] sm:$0xff]  ;;  %v281_v62 = vld [vmem:[%s1321_s27 + $0xf0] sm:$0xff] }
  0x23   : > { %v297_v59 = vpack.c.bf16 %v280_v57, %v279_v56  ;;  %v268_v61 = vld [vmem:[%s1321_s27 + $0x88] sm:$0xff]  ;;  %v282_v63 = vld [vmem:[%s1321_s27 + $0xf8] sm:$0xff]  ;;  %v323_v4 = vld [vmem:[%s1641_s2] sm:$0x3] }
  0x24   : > { %385 = vmatpush.bf16.msra.mxu0 %v315_v22  ;;  %947 = vmatpush.bf16.msra.mxu2 %v315_v22  ;;  %v291_v0 = vpack.c.bf16 %v268_v61, %v267_v60  ;;  %v298_v1 = vpack.c.bf16 %v282_v63, %v281_v62  ;;  %v1390_v5 = vperm.slane %v323_v4, 0  ;;  %v1392_v6 = vperm.slane %v323_v4, 1  ;;  %v269_v15 = vld [vmem:[%s1321_s27 + $0x90] sm:$0xff]  ;;  %v270_v16 = vld [vmem:[%s1321_s27 + $0x98] sm:$0xff]  ;;  %v271_v28 = vld [vmem:[%s1321_s27 + $0xa0] sm:$0xff] }
  0x25   : > { %474 = vmatpush.bf16.msra.mxu1 %v316_v25  ;;  %951 = vmatpush.bf16.msra.mxu3 %v316_v25  ;;  %v292_v17 = vpack.c.bf16 %v270_v16, %v269_v15 }
  0x27   : > { %907 = vmatmul.msk.bf16.vlgmr.msra.gmra.mxu0 %vm329_vm0, %v283_v26  ;;  %919 = vmatmul.msk.bf16.vlgmr.msra.gmra.mxu2 %vm329_vm0, %v295_v44 }
  0x28   : > { %923 = vmatmul.msk.bf16.vlgmr.msra.gmra.mxu1 %vm329_vm0, %v283_v26  ;;  %934 = vmatmul.msk.bf16.vlgmr.msra.gmra.mxu3 %vm329_vm0, %v1347_v38 }
  0x37   : > { %908 = vmatmul.msk.bf16.gmra.mxu0 %vm329_vm0, %v284_v29  ;;  %920 = vmatmul.msk.bf16.gmra.mxu2 %vm329_vm0, %v296_v50 }
  0x38   : > { %924 = vmatmul.msk.bf16.gmra.mxu1 %vm329_vm0, %v284_v29  ;;  %935 = vmatmul.msk.bf16.gmra.mxu3 %vm329_vm0, %v295_v44  ;;  %v272_v29 = vld [vmem:[%s1321_s27 + $0xa8] sm:$0xff] }
  0x39   : > { %v293_v30 = vpack.c.bf16 %v272_v29, %v271_v28 }
  0x47   : > { %909 = vmatmul.msk.bf16.gmra.mxu0 %vm329_vm0, %v285_v32  ;;  %921 = vmatmul.msk.bf16.gmra.mxu2 %vm329_vm0, %v297_v59 }
  0x48   : > { %925 = vmatmul.msk.bf16.gmra.mxu1 %vm329_vm0, %v285_v32  ;;  %936 = vmatmul.msk.bf16.gmra.mxu3 %vm329_vm0, %v296_v50 }
  0x57   : > { %910 = vmatmul.msk.bf16.gmra.mxu0 %vm329_vm0, %v286_v35  ;;  %922 = vmatmul.msk.bf16.gmra.mxu2 %vm329_vm0, %v298_v1 }
  0x58   : > { %926 = vmatmul.msk.bf16.gmra.mxu1 %vm329_vm0, %v286_v35  ;;  %937 = vmatmul.msk.bf16.gmra.mxu3 %vm329_vm0, %v297_v59 }
  0x67   : > { %911 = vmatmul.msk.bf16.gmra.mxu0 %vm329_vm0, %v287_v41 }
  0x68   : > { %927 = vmatmul.msk.bf16.gmra.mxu1 %vm329_vm0, %v287_v41  ;;  %938 = vmatmul.msk.bf16.gmra.mxu3 %vm329_vm0, %v298_v1 }
  0x77   : > { %912 = vmatmul.msk.bf16.gmra.mxu0 %vm329_vm0, %v288_v47 }
  0x78   : > { %928 = vmatmul.msk.bf16.gmra.mxu1 %vm329_vm0, %v288_v47 }
  0x87   : > { %913 = vmatmul.msk.bf16.gmra.mxu0 %vm329_vm0, %v289_v53 }
  0x88   : > { %929 = vmatmul.msk.bf16.gmra.mxu1 %vm329_vm0, %v289_v53 }
  0x97   : > { %914 = vmatmul.msk.bf16.gmra.mxu0 %vm329_vm0, %v290_v58 }
  0x98   : > { %930 = vmatmul.msk.bf16.gmra.mxu1 %vm329_vm0, %v290_v58 }
  0xa4   : > { %v387_v2 = vpop.f32.mrf.mxu0 }
  0xa5   : > { %v476_v3 = vpop.f32.mrf.mxu1  ;;  %v388_v8 = vadd.f32 %v387_v2, %v1390_v5 }
  0xa6   : > { %v477_v11 = vadd.f32 %v476_v3, %v1392_v6 }
  0xa7   : > { %915 = vmatmul.msk.bf16.gmra.mxu0 %vm329_vm0, %v291_v0 }
  0xa8   : > { %931 = vmatmul.msk.bf16.gmra.mxu1 %vm329_vm0, %v291_v0 }
  0xaa   : > { %v447_v4 = vpop.f32.mrf.mxu2 }
  0xab   : > { %v531_v54 = vpop.f32.mrf.mxu3 }
  0xac   : > { %v389_v7 = vpop.f32.mrf.mxu0  ;;  %v532_v61 = vadd.f32 %v531_v54, %v1392_v6 }
  0xad   : > { %v390_v9 = vadd.f32 %v389_v7, %v1390_v5  ;;  %v478_v10 = vpop.f32.mrf.mxu1 }
  0xae   : > { %v479_v12 = vadd.f32 %v478_v10, %v1392_v6  ;;  %v448_v10 = vadd.f32 %v447_v4, %v1390_v5 }
  0xaf   : > { %v1398_v13 = vpack.c.bf16 %v390_v9, %v388_v8 }
  0xb0   : > { %v1400_v14 = vpack.c.bf16 %v479_v12, %v477_v11 }
  0xb2   : > { %v449_v12 = vpop.f32.mrf.mxu2 }
  0xb3   : > { %v533_v63 = vpop.f32.mrf.mxu3  ;;  %v450_v16 = vadd.f32 %v449_v12, %v1390_v5 }
  0xb4   : > { %v392_v18 = vpop.f32.mrf.mxu0  ;;  %v534_v0 = vadd.f32 %v533_v63, %v1392_v6 }
  0xb5   : > { %v481_v19 = vpop.f32.mrf.mxu1  ;;  %v393_v21 = vadd.f32 %v392_v18, %v1390_v5  ;;  %v1452_v18 = vpack.c.bf16 %v450_v16, %v448_v10 }
  0xb6   : > { %v482_v24 = vadd.f32 %v481_v19, %v1392_v6  ;;  %v1446_v1 = vpack.c.bf16 %v534_v0, %v532_v61 }
  0xb7   : > { %916 = vmatmul.msk.bf16.gmra.mxu0 %vm329_vm0, %v292_v17 }
  0xb8   : > { %932 = vmatmul.msk.bf16.gmra.mxu1 %vm329_vm0, %v292_v17 }
  0xba   : > { %v1456_v28 = vpop.f32.mrf.mxu2 }
  0xbb   : > { %v536_v7 = vpop.f32.mrf.mxu3 }
  0xbc   : > { %v394_v20 = vpop.f32.mrf.mxu0  ;;  %v537_v11 = vadd.f32 %v536_v7, %v1392_v6 }
  0xbd   : > { %v395_v22 = vadd.f32 %v394_v20, %v1390_v5  ;;  %v483_v23 = vpop.f32.mrf.mxu1 }
  0xbe   : > { %v484_v25 = vadd.f32 %v483_v23, %v1392_v6 }
  0xbf   : > { %v1410_v26 = vpack.c.bf16 %v395_v22, %v393_v21 }
  0xc0   : > { %v1412_v27 = vpack.c.bf16 %v484_v25, %v482_v24 }
  0xc3   : > { %v538_v15 = vpop.f32.mrf.mxu3 }
  0xc4   : > { %v397_v31 = vpop.f32.mrf.mxu0  ;;  %v539_v17 = vadd.f32 %v538_v15, %v1392_v6 }
  0xc5   : > { %v486_v32 = vpop.f32.mrf.mxu1  ;;  %v398_v34 = vadd.f32 %v397_v31, %v1390_v5 }
  0xc6   : > { %v487_v37 = vadd.f32 %v486_v32, %v1392_v6  ;;  %v1454_v19 = vpack.c.bf16 %v539_v17, %v537_v11 }
  0xc7   : > { %917 = vmatmul.msk.bf16.gmra.mxu0 %vm329_vm0, %v293_v30 }
  0xc8   : > { %933 = vmatmul.msk.bf16.gmra.mxu1 %vm329_vm0, %v293_v30 }
  0xcb   : > { %v1458_v29 = vpop.f32.mrf.mxu3 }
  0xcc   : > { %v399_v33 = vpop.f32.mrf.mxu0 }
  0xcd   : > { %v400_v35 = vadd.f32 %v399_v33, %v1390_v5  ;;  %v488_v36 = vpop.f32.mrf.mxu1 }
  0xce   : > { %v489_v39 = vadd.f32 %v488_v36, %v1392_v6 }
  0xcf   : > { %v1422_v40 = vpack.c.bf16 %v400_v35, %v398_v34 }
  0xd0   : > { %v1424_v41 = vpack.c.bf16 %v489_v39, %v487_v37 }
  0xd3   : > { %v1470_v54 = vpop.f32.mrf.mxu3 }
  0xd4   : > { %v402_v42 = vpop.f32.mrf.mxu0 }
  0xd5   : > { %v491_v43 = vpop.f32.mrf.mxu1  ;;  %v403_v45 = vadd.f32 %v402_v42, %v1390_v5 }
  0xd6   : > { %v492_v48 = vadd.f32 %v491_v43, %v1392_v6 }
  0xd7   : > { %918 = vmatmul.msk.bf16.gmra.mxu0 %vm329_vm0, %v1347_v38 }
  0xdc   : > { %v404_v44 = vpop.f32.mrf.mxu0 }
  0xdd   : > { %v405_v46 = vadd.f32 %v404_v44, %v1390_v5  ;;  %v493_v47 = vpop.f32.mrf.mxu1 }
  0xde   : > { %v494_v49 = vadd.f32 %v493_v47, %v1392_v6 }
  0xdf   : > { %v1432_v50 = vpack.c.bf16 %v405_v46, %v403_v45 }
  0xe0   : > { %v1434_v51 = vpack.c.bf16 %v494_v49, %v492_v48 }
  0xe4   : > { %v407_v52 = vpop.f32.mrf.mxu0 }
  0xe5   : > { %v496_v53 = vpop.f32.mrf.mxu1  ;;  %v408_v38 = vadd.f32 %v407_v52, %v1390_v5 }
  0xe6   : > { %v497_v58 = vadd.f32 %v496_v53, %v1392_v6  ;;  %v1468_v53 = vpop.f32.mrf.mxu2 }
  0xec   : > { %v409_v55 = vpop.f32.mrf.mxu0 }
  0xed   : > { %v410_v56 = vadd.f32 %v409_v55, %v1390_v5  ;;  %v498_v57 = vpop.f32.mrf.mxu1 }
  0xee   : > { %v499_v59 = vadd.f32 %v498_v57, %v1392_v6 }
  0xef   : > { %v1440_v60 = vpack.c.bf16 %v410_v56, %v408_v38 }
  0xf0   : > { %v1443_v62 = vpack.c.bf16 %v499_v59, %v497_v58 }
  0xf4   : > { %v412_v2 = vpop.f32.mrf.mxu0 }
  0xf5   : > { %v501_v3 = vpop.f32.mrf.mxu1  ;;  %v413_v58 = vadd.f32 %v412_v2, %v1390_v5 }
  0xf6   : > { %v502_v4 = vadd.f32 %v501_v3, %v1392_v6 }
  0xfc   : > { %v414_v8 = vpop.f32.mrf.mxu0 }
  0xfd   : > { %v503_v9 = vpop.f32.mrf.mxu1  ;;  %v415_v38 = vadd.f32 %v414_v8, %v1390_v5 }
  0xfe   : > { %v504_v59 = vadd.f32 %v503_v9, %v1392_v6 }
  0xff   : > { %v567_v7 = vpack.c.bf16 %v415_v38, %v413_v58  ;;  %v603_v38 = vunpack.c.h.bf16 %v1432_v50  ;;  %v604_v58 = vunpack.c.h.bf16 %v1434_v51 }
 0x100   : > { %v568_v12 = vpack.c.bf16 %v504_v59, %v502_v4 }
 0x101   : > { %v609_v17 = vunpack.c.l.bf16 %v567_v7 }
 0x104   : > { %v417_v20 = vpop.f32.mrf.mxu0 }
 0x105   : > { %v506_v21 = vpop.f32.mrf.mxu1  ;;  %v418_v37 = vadd.f32 %v417_v20, %v1390_v5  ;;  %v1477_v20 = vpop.f32.mrf.mxu2 }
 0x106   : > { %v507_v44 = vadd.f32 %v506_v21, %v1392_v6  ;;  %v611_v21 = vunpack.c.h.bf16 %v567_v7 }
 0x10c   : > { %v419_v22 = vpop.f32.mrf.mxu0 }
 0x10d   : > { %v508_v23 = vpop.f32.mrf.mxu1  ;;  %v420_v31 = vadd.f32 %v419_v22, %v1390_v5  ;;  %v1480_v22 = vpop.f32.mrf.mxu3 }
 0x10e   : > { %v509_v39 = vadd.f32 %v508_v23, %v1392_v6 }
 0x10f   : > { %v569_v45 = vpack.c.bf16 %v420_v31, %v418_v37  ;;  %v612_v31 = vunpack.c.h.bf16 %v568_v12  ;;  %v607_v37 = vunpack.c.h.bf16 %v1440_v60 }
 0x110   : > { %v570_v52 = vpack.c.bf16 %v509_v39, %v507_v44 }
 0x111   : > { %v613_v56 = vunpack.c.l.bf16 %v569_v45  ;;  %v615_v57 = vunpack.c.h.bf16 %v569_v45  ;;  %v608_v45 = vunpack.c.h.bf16 %v1443_v62 }
 0x112   : > { %v614_v61 = vunpack.c.l.bf16 %v570_v52  ;;  %v616_v63 = vunpack.c.h.bf16 %v570_v52 }
 0x114   : > { %v422_v24 = vpop.f32.mrf.mxu0 }
 0x115   : > { %v511_v25 = vpop.f32.mrf.mxu1  ;;  %v423_v32 = vadd.f32 %v422_v24, %v1390_v5  ;;  %v610_v24 = vunpack.c.l.bf16 %v568_v12  ;;  %v599_v12 = vunpack.c.h.bf16 %v1422_v40 }
 0x116   : > { %v512_v35 = vadd.f32 %v511_v25, %v1392_v6 }
 0x11c   : > { %v424_v30 = vpop.f32.mrf.mxu0 }
 0x11d   : > { %v425_v33 = vadd.f32 %v424_v30, %v1390_v5  ;;  %v513_v34 = vpop.f32.mrf.mxu1 }
 0x11e   : > { %v514_v36 = vadd.f32 %v513_v34, %v1392_v6 }
 0x11f   : > { %v571_v42 = vpack.c.bf16 %v425_v33, %v423_v32 }
 0x120   : > { %v572_v43 = vpack.c.bf16 %v514_v36, %v512_v35  ;;  %v605_v35 = vunpack.c.l.bf16 %v1440_v60  ;;  %v601_v60 = vunpack.c.l.bf16 %v1432_v50  ;;  %v597_v50 = vunpack.c.l.bf16 %v1422_v40 }
 0x121   : > { %v617_v46 = vunpack.c.l.bf16 %v571_v42  ;;  %v619_v47 = vunpack.c.h.bf16 %v571_v42  ;;  %v606_v42 = vunpack.c.l.bf16 %v1443_v62  ;;  %v602_v62 = vunpack.c.l.bf16 %v1434_v51 }
 0x122   : > { %v618_v48 = vunpack.c.l.bf16 %v572_v43  ;;  %v620_v49 = vunpack.c.h.bf16 %v572_v43  ;;  %v1487_v43 = vpop.f32.mrf.mxu2 }
 0x123   : > { %990 = vtanh.f32 %v617_v46  ;;  %v1490_v46 = vpop.f32.mrf.mxu3 }
 0x124   : > { %992 = vtanh.f32 %v619_v47  ;;  %v427_v55 = vpop.f32.mrf.mxu0 }
 0x125   : > { %994 = vtanh.f32 %v618_v48  ;;  %v428_v15 = vadd.f32 %v427_v55, %v1390_v5 }
 0x126   : > { %996 = vtanh.f32 %v620_v49 }
 0x127   : > { %998 = vtanh.f32 %v613_v56 }
 0x128   : > { %1000 = vtanh.f32 %v615_v57 }
 0x129   : > { %v991_v0 = vpop.eup %990  ;;  %1002 = vtanh.f32 %v614_v61 }
 0x12a   : > { %v993_v10 = vpop.eup %992  ;;  %1004 = vtanh.f32 %v616_v63  ;;  %v462_v61 = vpop.f32.mrf.mxu2 }
 0x12b   : > { %v995_v11 = vpop.eup %994  ;;  %v731_v8 = vpack.c.bf16 %v993_v10, %v991_v0  ;;  %1006 = vtanh.f32 %v609_v17  ;;  %v551_v0 = vpop.f32.mrf.mxu3 }
 0x12c   : > { %v997_v16 = vpop.eup %996  ;;  %v429_v2 = vpop.f32.mrf.mxu0  ;;  %1008 = vtanh.f32 %v611_v21 }
 0x12d   : > { %757 = vmatpush.bf16.xpose.msrb.mxu2 %v731_v8  ;;  %v732_v9 = vpack.c.bf16 %v997_v16, %v995_v11  ;;  %v430_v3 = vadd.f32 %v429_v2, %v1390_v5  ;;  %v999_v23 = vpop.eup %998  ;;  %1010 = vtanh.f32 %v610_v24  ;;  %v1500_v10 = vpop.f32.mrf.mxu1  ;;  %v598_v8 = vunpack.c.l.bf16 %v1424_v41 }
 0x12e   : > { %v1001_v30 = vpop.eup %1000  ;;  %1012 = vtanh.f32 %v612_v31  ;;  %v600_v16 = vunpack.c.h.bf16 %v1424_v41  ;;  %v595_v31 = vunpack.c.h.bf16 %v1410_v26  ;;  %v463_v41 = vadd.f32 %v462_v61, %v1390_v5 }
 0x12f   : > { %770 = vmatpush.bf16.xpose.msrb.mxu3 %v732_v9  ;;  %v1482_v25 = vpack.c.bf16 %v430_v3, %v428_v15  ;;  %v1003_v32 = vpop.eup %1002  ;;  %v729_v34 = vpack.c.bf16 %v1001_v30, %v999_v23  ;;  %1014 = vtanh.f32 %v605_v35  ;;  %v593_v23 = vunpack.c.l.bf16 %v1410_v26 }
 0x130   : > { %v1005_v33 = vpop.eup %1004  ;;  %1016 = vtanh.f32 %v607_v37  ;;  %v552_v37 = vadd.f32 %v551_v0, %v1392_v6  ;;  %v589_v26 = vunpack.c.l.bf16 %v1398_v13 }
 0x131   : > { %v730_v36 = vpack.c.bf16 %v1005_v33, %v1003_v32  ;;  %v1007_v39 = vpop.eup %1006  ;;  %1018 = vtanh.f32 %v606_v42 }
 0x132   : > { %v1009_v44 = vpop.eup %1008  ;;  %1020 = vtanh.f32 %v608_v45  ;;  %v464_v3 = vpop.f32.mrf.mxu2 }
 0x133   : > { %v1011_v47 = vpop.eup %1010  ;;  %v727_v52 = vpack.c.bf16 %v1009_v44, %v1007_v39  ;;  %1022 = vtanh.f32 %v601_v60  ;;  %v553_v21 = vpop.f32.mrf.mxu3  ;;  %v465_v32 = vadd.f32 %v464_v3, %v1390_v5 }
 0x134   : > { %v1492_v48 = vpop.f32.mrf.mxu0  ;;  %v1013_v49 = vpop.eup %1012  ;;  %1024 = vtanh.f32 %v603_v38  ;;  %v554_v39 = vadd.f32 %v553_v21, %v1392_v6  ;;  %v458_v38 = vadd.f32 %v1477_v20, %v1390_v5  ;;  %v549_v20 = vadd.f32 %v1490_v46, %v1392_v6 }
 0x135   : > { %758 = vmatpush.bf16.xpose.msrb.mxu2 %v729_v34  ;;  %v728_v55 = vpack.c.bf16 %v1013_v49, %v1011_v47  ;;  %v1015_v56 = vpop.eup %1014  ;;  %1026 = vtanh.f32 %v602_v62  ;;  %v1509_v30 = vpop.f32.mrf.mxu1  ;;  %v594_v34 = vunpack.c.l.bf16 %v1412_v27  ;;  %v587_v45 = vpack.c.bf16 %v465_v32, %v463_v41 }
 0x136   : > { %v1017_v57 = vpop.eup %1016  ;;  %1028 = vtanh.f32 %v604_v58  ;;  %v591_v47 = vunpack.c.h.bf16 %v1398_v13  ;;  %v588_v60 = vpack.c.bf16 %v554_v39, %v552_v37  ;;  %v453_v46 = vadd.f32 %v1456_v28, %v1390_v5 }
 0x137   : > { %771 = vmatpush.bf16.xpose.msrb.mxu3 %v730_v36  ;;  %v1019_v59 = vpop.eup %1018  ;;  %v725_v4 = vpack.c.bf16 %v1017_v57, %v1015_v56  ;;  %1030 = vtanh.f32 %v597_v50  ;;  %v596_v36 = vunpack.c.h.bf16 %v1412_v27  ;;  %v592_v27 = vunpack.c.h.bf16 %v1400_v14 }
 0x138   : > { %v1021_v63 = vpop.eup %1020  ;;  %1032 = vtanh.f32 %v599_v12  ;;  %v460_v56 = vadd.f32 %v1487_v43, %v1390_v5  ;;  %v649_v62 = vunpack.c.l.bf16 %v587_v45  ;;  %v651_v13 = vunpack.c.h.bf16 %v587_v45 }
 0x139   : > { %v726_v11 = vpack.c.bf16 %v1021_v63, %v1019_v59  ;;  %v1023_v51 = vpop.eup %1022  ;;  %1034 = vtanh.f32 %v598_v8  ;;  %v650_v63 = vunpack.c.l.bf16 %v588_v60  ;;  %v652_v43 = vunpack.c.h.bf16 %v588_v60 }
 0x13a   : > { %v1025_v15 = vpop.eup %1024  ;;  %1036 = vtanh.f32 %v600_v16  ;;  %v585_v50 = vpack.c.bf16 %v460_v56, %v458_v38  ;;  %v455_v16 = vadd.f32 %v1468_v53, %v1390_v5  ;;  %v542_v21 = vadd.f32 %v1458_v29, %v1392_v6 }
 0x13b   : > { %v1027_v2 = vpop.eup %1026  ;;  %v723_v9 = vpack.c.bf16 %v1025_v15, %v1023_v51  ;;  %1038 = vtanh.f32 %v593_v23  ;;  %v544_v23 = vadd.f32 %v1470_v54, %v1392_v6  ;;  %v637_v56 = vunpack.c.l.bf16 %v1452_v18 }
 0x13c   : > { %v1498_v7 = vpop.f32.mrf.mxu0  ;;  %v1029_v17 = vpop.eup %1028  ;;  %1040 = vtanh.f32 %v595_v31 }
 0x13d   : > { %759 = vmatpush.bf16.xpose.msrb.mxu2 %v727_v52  ;;  %v724_v40 = vpack.c.bf16 %v1029_v17, %v1027_v2  ;;  %v1031_v33 = vpop.eup %1030  ;;  %1042 = vtanh.f32 %v594_v34  ;;  %v590_v52 = vunpack.c.l.bf16 %v1400_v14  ;;  %v1528_v59 = vpop.f32.mrf.mxu1  ;;  %v547_v14 = vadd.f32 %v1480_v22, %v1392_v6 }
 0x13e   : > { %v1033_v35 = vpop.eup %1032  ;;  %1044 = vtanh.f32 %v596_v36  ;;  %v645_v2 = vunpack.c.l.bf16 %v585_v50  ;;  %v583_v34 = vpack.c.bf16 %v455_v16, %v453_v46  ;;  %v584_v36 = vpack.c.bf16 %v544_v23, %v542_v21 }
 0x13f   : > { %772 = vmatpush.bf16.xpose.msrb.mxu3 %v728_v55  ;;  %v1035_v42 = vpop.eup %1034  ;;  %v721_v49 = vpack.c.bf16 %v1033_v35, %v1031_v33  ;;  %1046 = vtanh.f32 %v589_v26  ;;  %v586_v51 = vpack.c.bf16 %v549_v20, %v547_v14  ;;  %v639_v20 = vunpack.c.h.bf16 %v1452_v18 }
 0x140   : > { %v1037_v44 = vpop.eup %1036  ;;  %1048 = vtanh.f32 %v591_v47  ;;  %v641_v39 = vunpack.c.l.bf16 %v583_v34  ;;  %v642_v45 = vunpack.c.l.bf16 %v584_v36  ;;  %v636_v21 = vunpack.c.h.bf16 %v1446_v1 }
 0x141   : > { %v722_v55 = vpack.c.bf16 %v1037_v44, %v1035_v42  ;;  %v1039_v57 = vpop.eup %1038  ;;  %1050 = vtanh.f32 %v590_v52  ;;  %v648_v41 = vunpack.c.h.bf16 %v586_v51  ;;  %v556_v42 = vld [vmem:[%s1642_s3] sm:$0x3]  ;;  %v643_v44 = vunpack.c.h.bf16 %v583_v34 }
 0x142   : > { %v1041_v61 = vpop.eup %1040  ;;  %1052 = vtanh.f32 %v592_v27  ;;  %752 = vst [vmem:[#allocation1] ss:$9 sm:$0xff] %v556_v42 }
 0x143   : > { %v1043_v0 = vpop.eup %1042  ;;  %1054 = vtanh.f32 %v649_v62 }
 0x144   : > { %v1507_v24 = vpop.f32.mrf.mxu0  ;;  %1056 = vtanh.f32 %v651_v13 }
 0x145   : > { %760 = vmatpush.bf16.xpose.msrb.mxu2 %v725_v4  ;;  %v1045_v4 = vpop.eup %1044  ;;  %1058 = vtanh.f32 %v650_v63  ;;  %v1542_v33 = vpop.f32.mrf.mxu1 }
 0x146   : > { %v1047_v12 = vpop.eup %1046  ;;  %1060 = vtanh.f32 %v652_v43  ;;  %v720_v15 = vpack.c.bf16 %v1045_v4, %v1043_v0  ;;  %v638_v0 = vunpack.c.l.bf16 %v1454_v19  ;;  %v640_v4 = vunpack.c.h.bf16 %v1454_v19 }
 0x147   : > { %773 = vmatpush.bf16.xpose.msrb.mxu3 %v726_v11  ;;  %v719_v11 = vpack.c.bf16 %v1041_v61, %v1039_v57  ;;  %v1049_v8 = vpop.eup %1048  ;;  %1062 = vtanh.f32 %v645_v2  ;;  %v634_v2 = vunpack.c.l.bf16 %v1446_v1 }
 0x148   : > { %v1051_v22 = vpop.eup %1050  ;;  %v717_v35 = vpack.c.bf16 %v1049_v8, %v1047_v12  ;;  %v438_v8 = vadd.f32 %v1507_v24, %v1390_v5 }
 0x149   : > { %v1053_v17 = vpop.eup %1052  ;;  %v1550_v61 = vld [vmem:[#allocation1] sm:$0xff]  ;;  %v1552_v14 = vld [vmem:[#allocation1 + $0x9] sm:$0xff] }
 0x14a   : > { %v1055_v3 = vpop.eup %1054  ;;  %v718_v29 = vpack.c.bf16 %v1053_v17, %v1051_v22 }
 0x14b   : > { %v1057_v31 = vpop.eup %1056 }
 0x14c   : > { %v1526_v58 = vpop.f32.mrf.mxu0  ;;  %v1059_v28 = vpop.eup %1058  ;;  %v747_v37 = vpack.c.bf16 %v1057_v31, %v1055_v3 }
 0x14d   : > { %761 = vmatpush.bf16.xpose.msrb.mxu2 %v723_v9  ;;  %v647_v9 = vunpack.c.h.bf16 %v585_v50  ;;  %v1061_v53 = vpop.eup %1060 }
 0x14e   : > { %v748_v54 = vpack.c.bf16 %v1061_v53, %v1059_v28  ;;  %v1063_v26 = vpop.eup %1062 }
 0x14f   : > { %774 = vmatpush.bf16.xpose.msrb.mxu3 %v724_v40  ;;  %v646_v40 = vunpack.c.l.bf16 %v586_v51  ;;  %1064 = vtanh.f32 %v647_v9 }
 0x151   : > { %1066 = vtanh.f32 %v646_v40 }
 0x152   : > { %1068 = vtanh.f32 %v648_v41  ;;  %v433_v41 = vadd.f32 %v1492_v48, %v1390_v5 }
 0x153   : > { %1070 = vtanh.f32 %v641_v39 }
 0x154   : > { %v442_v32 = vpop.f32.mrf.mxu0  ;;  %1072 = vtanh.f32 %v643_v44 }
 0x155   : > { %762 = vmatpush.bf16.xpose.msrb.mxu2 %v721_v49  ;;  %v1065_v47 = vpop.eup %1064  ;;  %v644_v49 = vunpack.c.h.bf16 %v584_v36  ;;  %1074 = vtanh.f32 %v642_v45  ;;  %v443_v62 = vadd.f32 %v442_v32, %v1390_v5  ;;  %v435_v32 = vadd.f32 %v1498_v7, %v1390_v5 }
 0x156   : > { %v745_v38 = vpack.c.bf16 %v1065_v47, %v1063_v26  ;;  %v524_v36 = vadd.f32 %v1542_v33, %v1392_v6  ;;  %v517_v33 = vadd.f32 %v1500_v10, %v1392_v6  ;;  %v519_v47 = vadd.f32 %v1509_v30, %v1392_v6 }
 0x157   : > { %775 = vmatpush.bf16.xpose.msrb.mxu3 %v722_v55  ;;  %v1067_v52 = vpop.eup %1066  ;;  %v526_v55 = vpop.f32.mrf.mxu1  ;;  %1076 = vtanh.f32 %v644_v49  ;;  %v575_v48 = vpack.c.bf16 %v435_v32, %v433_v41  ;;  %v623_v10 = vunpack.c.h.bf16 %v1482_v25 }
 0x158   : > { %v1069_v60 = vpop.eup %1068  ;;  %1078 = vtanh.f32 %v637_v56  ;;  %v527_v17 = vadd.f32 %v526_v55, %v1392_v6 }
 0x159   : > { %v746_v13 = vpack.c.bf16 %v1069_v60, %v1067_v52  ;;  %v1071_v63 = vpop.eup %1070  ;;  %1080 = vtanh.f32 %v639_v20  ;;  %v625_v44 = vunpack.c.l.bf16 %v575_v48 }
 0x15a   : > { %v1073_v43 = vpop.eup %1072  ;;  %1082 = vtanh.f32 %v638_v0 }
 0x15b   : > { %v1075_v50 = vpop.eup %1074  ;;  %v743_v51 = vpack.c.bf16 %v1073_v43, %v1071_v63  ;;  %1084 = vtanh.f32 %v640_v4 }
 0x15c   : > { %v444_v27 = vpop.f32.mrf.mxu0 }
 0x15d   : > { %763 = vmatpush.bf16.xpose.msrb.mxu2 %v719_v11  ;;  %v445_v57 = vadd.f32 %v444_v27, %v1390_v5  ;;  %v1077_v12 = vpop.eup %1076 }
 0x15e   : > { %v744_v46 = vpack.c.bf16 %v1077_v12, %v1075_v50  ;;  %v1079_v19 = vpop.eup %1078 }
 0x15f   : > { %776 = vmatpush.bf16.xpose.msrb.mxu3 %v720_v15  ;;  %v579_v11 = vpack.c.bf16 %v445_v57, %v443_v62  ;;  %v528_v18 = vpop.f32.mrf.mxu1  ;;  %v440_v15 = vadd.f32 %v1526_v58, %v1390_v5  ;;  %v1081_v3 = vpop.eup %1080  ;;  %v621_v62 = vunpack.c.l.bf16 %v1482_v25 }
 0x160   : > { %v529_v9 = vadd.f32 %v528_v18, %v1392_v6  ;;  %v1083_v23 = vpop.eup %1082  ;;  %v741_v31 = vpack.c.bf16 %v1081_v3, %v1079_v19 }
 0x161   : > { %v633_v22 = vunpack.c.l.bf16 %v579_v11  ;;  %v635_v16 = vunpack.c.h.bf16 %v579_v11  ;;  %v577_v24 = vpack.c.bf16 %v440_v15, %v438_v8  ;;  %v1085_v40 = vpop.eup %1084 }
 0x162   : > { %v578_v58 = vpack.c.bf16 %v529_v9, %v527_v17  ;;  %v742_v34 = vpack.c.bf16 %v1085_v40, %v1083_v23  ;;  %v815_v9 = vlaneseq }
 0x163   : > { %1086 = vtanh.f32 %v633_v22  ;;  %v629_v28 = vunpack.c.l.bf16 %v577_v24  ;;  %v631_v53 = vunpack.c.h.bf16 %v577_v24 }
 0x164   : > { %1088 = vtanh.f32 %v635_v16  ;;  %v632_v39 = vunpack.c.h.bf16 %v578_v58  ;;  %v750_v16 = vstv %s749_s15  ;;  %vm817_vm2 = vcmp.lt.s32.totalorder %v815_v9, 256 }
 0x165   : > { %764 = vmatpush.bf16.xpose.msrb.mxu2 %v717_v35  ;;  %1090 = vtanh.f32 %v634_v2  ;;  %v522_v35 = vadd.f32 %v1528_v59, %v1392_v6  ;;  %v627_v59 = vunpack.c.h.bf16 %v575_v48 }
 0x166   : > { %1092 = vtanh.f32 %v636_v21 }
 0x167   : > { %777 = vmatpush.bf16.xpose.msrb.mxu3 %v718_v29  ;;  %1094 = vtanh.f32 %v629_v28  ;;  %v576_v5 = vpack.c.bf16 %v524_v36, %v522_v35 }
 0x168   : > { %1096 = vtanh.f32 %v631_v53 }
 0x169   : > { %v1087_v1 = vpop.eup %1086  ;;  %v626_v49 = vunpack.c.l.bf16 %v576_v5  ;;  %v628_v60 = vunpack.c.h.bf16 %v576_v5 }
 0x16a   : > { %v1089_v29 = vpop.eup %1088 }
 0x16b   : > { %v739_v7 = vpack.c.bf16 %v1089_v29, %v1087_v1 }
 0x16c   : > { %765 = vmatmul.bf16.vlgmr.msrb.gmra.mxu2 %v1550_v61 }
 0x16d   : > { %783 = vmatpush.bf16.xpose.msra.mxu2 %v747_v37  ;;  %v630_v37 = vunpack.c.l.bf16 %v578_v58 }
 0x16e   : > { %778 = vmatmul.bf16.vlgmr.msrb.gmra.mxu3 %v1552_v14 }
 0x16f   : > { %796 = vmatpush.bf16.xpose.msra.mxu3 %v748_v54  ;;  %v1091_v54 = vpop.eup %1090  ;;  %1098 = vtanh.f32 %v630_v37 }
 0x170   : > { %v1093_v42 = vpop.eup %1092  ;;  %1100 = vtanh.f32 %v632_v39 }
 0x171   : > { %v740_v26 = vpack.c.bf16 %v1093_v42, %v1091_v54  ;;  %v1095_v45 = vpop.eup %1094  ;;  %1102 = vtanh.f32 %v625_v44 }
 0x172   : > { %v1097_v52 = vpop.eup %1096  ;;  %1104 = vtanh.f32 %v627_v59 }
 0x173   : > { %1106 = vtanh.f32 %v626_v49  ;;  %v737_v56 = vpack.c.bf16 %v1097_v52, %v1095_v45 }
 0x174   : > { %1108 = vtanh.f32 %v628_v60 }
 0x175   : > { %784 = vmatpush.bf16.xpose.msra.mxu2 %v745_v38  ;;  %v1099_v27 = vpop.eup %1098  ;;  %v574_v38 = vpack.c.bf16 %v519_v47, %v517_v33  ;;  %1110 = vtanh.f32 %v621_v62 }
 0x176   : > { %v1101_v55 = vpop.eup %1100  ;;  %1112 = vtanh.f32 %v623_v10 }
 0x177   : > { %797 = vmatpush.bf16.xpose.msra.mxu3 %v746_v13  ;;  %v738_v57 = vpack.c.bf16 %v1101_v55, %v1099_v27  ;;  %v1103_v13 = vpop.eup %1102  ;;  %v622_v6 = vunpack.c.l.bf16 %v574_v38  ;;  %v624_v20 = vunpack.c.h.bf16 %v574_v38 }
 0x178   : > { %v1105_v30 = vpop.eup %1104 }
 0x179   : > { %v1107_v63 = vpop.eup %1106  ;;  %1114 = vtanh.f32 %v622_v6  ;;  %v735_v43 = vpack.c.bf16 %v1105_v30, %v1103_v13 }
 0x17a   : > { %v1109_v0 = vpop.eup %1108  ;;  %1116 = vtanh.f32 %v624_v20 }
 0x17b   : > { %v736_v4 = vpack.c.bf16 %v1109_v0, %v1107_v63  ;;  %v1111_v50 = vpop.eup %1110 }
 0x17c   : > { %v1113_v11 = vpop.eup %1112 }
 0x17d   : > { %785 = vmatpush.bf16.xpose.msra.mxu2 %v743_v51  ;;  %v733_v51 = vpack.c.bf16 %v1113_v11, %v1111_v50 }
 0x17f   : > { %798 = vmatpush.bf16.xpose.msra.mxu3 %v744_v46  ;;  %v1115_v12 = vpop.eup %1114 }
 0x180   : > { %v1117_v25 = vpop.eup %1116 }
 0x181   : > { %v734_v18 = vpack.c.bf16 %v1117_v25, %v1115_v12 }
 0x185   : > { %786 = vmatpush.bf16.xpose.msra.mxu2 %v741_v31 }
 0x187   : > { %799 = vmatpush.bf16.xpose.msra.mxu3 %v742_v34 }
 0x18d   : > { %787 = vmatpush.bf16.xpose.msra.mxu2 %v739_v7 }
 0x18f   : > { %800 = vmatpush.bf16.xpose.msra.mxu3 %v740_v26 }
 0x195   : > { %788 = vmatpush.bf16.xpose.msra.mxu2 %v737_v56 }
 0x197   : > { %801 = vmatpush.bf16.xpose.msra.mxu3 %v738_v57 }
 0x19d   : > { %789 = vmatpush.bf16.xpose.msra.mxu2 %v735_v43 }
 0x19f   : > { %802 = vmatpush.bf16.xpose.msra.mxu3 %v736_v4 }
 0x1a5   : > { %790 = vmatpush.bf16.xpose.msra.mxu2 %v733_v51 }
 0x1a7   : > { %803 = vmatpush.bf16.xpose.msra.mxu3 %v734_v18 }
 0x1ac   : > { %791 = vmatmul.bf16.vlgmr.msra.gmra.mxu2 %v1550_v61 }
 0x1ae   : > { %804 = vmatmul.bf16.vlgmr.msra.gmra.mxu3 %v1552_v14 }
 0x1ef   : > { %v766_v8 = vpop.f32.mrf.mxu2 }
 0x1f0   : > { %v767_v2 = vadd.f32 %v766_v8, %v750_v16 }
 0x1f1   : > { %v779_v15 = vpop.f32.mrf.mxu3 }
 0x1f2   : > { %v780_v23 = vadd.f32 %v779_v15, %v767_v2 }
 0x1f7   : > { %v768_v22 = vpop.f32.mrf.mxu2 }
 0x1f9   : > { %v781_v46 = vpop.f32.mrf.mxu3 }
 0x22f   : > { %v792_v19 = vpop.f32.mrf.mxu2 }
 0x230   : > { %v793_v17 = vadd.f32 %v792_v19, %v750_v16 }
 0x231   : > { %v805_v3 = vpop.f32.mrf.mxu3 }
 0x232   : > { %v806_v21 = vadd.f32 %v805_v3, %v793_v17 }
 0x234   : > { %v811_v24 = vrot.slane %v806_v21, 7 }
 0x235   : > { %827 = sbr.rel (!%p1265_p5) target bundleno = 599 (0x257), region = 44 }
 0x236   : > { %v813_v61 = vsel %vm812_vm1, %v780_v23, %v811_v24 }
 0x237   : > { %819 = vst.msk [vmem:[%s231_s17] sm:$0x3] %vm817_vm2, %v813_v61  ;;  %v794_v14 = vpop.f32.mrf.mxu2 }
 0x239   : > { %v807_v40 = vpop.f32.mrf.mxu3 }
 0x23a   : > { %s1654_s24 = smov (!%p830_p11, %s829_s24), 2 }
 0x23b   : > { %s832_s26 = ssub.s32 2, %s1654_s24 }
 0x23c   : > { %s833_s27 = sshll.u32 %s832_s26, 4 }
 0x23d   : > { %834 = vsyncadd %s1584_s18, %s833_s27  ;;  %p941_p12 = scmp.ne.s32.totalorder %s1654_s24, 0  ;;  %s836_s29 = scalar_lea.hbm %s1644_s5, %s940_s19 }
 0x23e   : > { %s837_s7 = sshll.u32 %s1654_s24, 4  ;;  %s1598_s8 = sshll.u32 %s231_s17, 4  ;;  %s839_s8 = int_to_ptr.vmem [resolvable:$true] %s1598_s8 }
 0x23f   : > { %s840_s4 = sshll.u32 %s836_s29, 4  ;;  %s1118_s9 = sshra.s32 %s839_s8, 4  ;;  %s841_s4 = int_to_ptr.hbm [resolvable:$true] %s840_s4  ;;  %s1119_s9 = int_to_ptr.vmem [resolvable:$true] %s1118_s9 }
 0x240   : > { %s1120_s10 = sshrl.u32 %s837_s7, 4  ;;  %s1193_s13 = smov [#allocation3]  }
 0x241   : > { %s1125_s11 = scalar_lea.vmem %s1119_s9, %s1120_s10  ;;  %s1129_s14 = scalar_lea.vmem %s1193_s13, 4 }
 0x242   : > { %p1126_p13 = scmp.ne.s32.totalorder %s1119_s9, %s1125_s11  ;;  %p1131_p2 = scmp.lt.s32.totalorder %s1129_s14, %s1125_s11 }
 0x244   : > { %p1127_p0 = pnand %p1126_p13, %p941_p12 }
 0x246   : > { %p1128_p1 = pneg %p1127_p0 }
 0x248   : > { %p1133_p3 = pnand %p1131_p2, %p1128_p1 }
 0x24a   : > { %1136 = shalt.err (!%p1133_p3)
}
 0x24b   : > { %s1137_s15 = sshra.s32 %s841_s4, 4  ;;  %s1148_s26 = scalar_lea.hbm %s1644_s5, 3  ;;  %s1138_s15 = int_to_ptr.hbm [resolvable:$true] %s1137_s15 }
 0x24c   : > { %s1144_s16 = scalar_lea.hbm %s1138_s15, %s1120_s10  ;;  %p1149_p8 = scmp.lt.s32.totalorder %s1138_s15, %s1644_s5 }
 0x24d   : > { %p1145_p4 = scmp.ne.s32.totalorder %s1138_s15, %s1144_s16  ;;  %p1150_p9 = scmp.lt.s32.totalorder %s1148_s26, %s1144_s16 }
 0x24f   : > { %p1146_p5 = pnand %p1145_p4, %p941_p12  ;;  %p1151_p10 = por %p1150_p9, %p1149_p8 }
 0x251   : > { %p1147_p7 = pneg %p1146_p5 }
 0x253   : > { %p1152_p11 = pnand %p1151_p10, %p1147_p7 }
 0x255   : > { %1155 = shalt.err (!%p1152_p11)
}
 0x256   : > { %843 = dma.vmem_to_hbm [thread:$0]  (%p941_p12), %s839_s8, %s837_s7, %s841_s4, %s1584_s18  }
 0x257 PF: > { %p957_p13 = scmp.ge.s32.totalorder %s1191_s23, 2  ;;  %s852_s6 = sand.u32 1, %s1179_s20  }
 0x258   : > { %s853_s29 = scalar_lea.sflag [#allocation4], %s852_s6 }
 0x259   : > { %p954_p0 = pnand %p957_p13, %p1269_p6 }
 0x25b   : > { %p955_p1 = pneg %p954_p0 }
 0x25d   : > { %1174 = dma.done.wait (%p955_p1), %s853_s29, 32  }
 0x25e   : > { %1176 = vsyncadd (%p955_p1), %s853_s29, 4294967264  ;;  %p16_p2 = scmp.ge.s32.totalorder %s1252_s25, 4   ;;  %s1647_s20 = smov %s1183_s21 }
 0x25f   : > { %s1648_s21 = smov %s1187_s22  ;;  %s1649_s22 = smov %s1263_s28 }
 0x260   : > { %s1650_s23 = smov %s1252_s25  ;;  %18 = sbr.rel (!%p16_p2) target bundleno = 5 (0x5), region = 75 }
 0x265   :  { %859 = vsyncpa [#allocation4], 1 }
 0x266   :  { %861 = vsyncpa [#allocation4 + $0x1], 1 }

// kernel: tpu_custom_call.1
= control target key start
LH: loop header
LB: loop body
LE: loop exit
PB: predicated region body
PF: predicated region fallthrough
CT: control target
= control target key end

     0   :  { %s1639_s0 = inlined_call_operand.vmem [shape: f32[384,64], index: 0, kind: input, shape index: {}]   ;;  %s1640_s1 = inlined_call_operand.vmem [shape: f32[64,256], index: 1, kind: input, shape index: {}]   ;;  %s1641_s2 = inlined_call_operand.vmem [shape: f32[1,256], index: 2, kind: input, shape index: {}]   ;;  %s1642_s3 = inlined_call_operand.vmem [shape: bf16[1,256], index: 3, kind: input, shape index: {}]   ;;  %s1643_s4 = inlined_call_operand.<no memory space> [shape: f32[1,1], index: 4, kind: input, shape index: {}]   ;;  %s1644_s5 = inlined_call_operand.hbm [shape: f32[1,384], index: 5, kind: output, shape index: {}]  }
   0x1   :  { %10 = sst [smem:[#allocation2]] %s1643_s4 }
   0x2   :  { %11 = vsyncpa [#allocation4], 0 }
   0x3   :  { %13 = vsyncpa [#allocation4 + $0x1], 0  ;;  %s1227_s20 = smov 0   ;;  %s1229_s21 = smov 0  }
   0x4   :  { %s1231_s22 = smov 0   ;;  %s1233_s23 = smov 0  }
   0x5 LB: > { %s1248_s4 = sadd.s32 4294967295, %s1191_s23   ;;  %s900_s24 = sadd.s32 4294967294, %s1191_s23   ;;  %s1191_s23 = sphi %s1233_s23, %s1650_s23   ;;  %s1187_s22 = sphi %s1231_s22, %s1649_s22   ;;  %s1183_s21 = sphi %s1229_s21, %s1648_s21   ;;  %s1179_s20 = sphi %s1227_s20, %s1647_s20  }
   0x6   : > { %s1252_s25 = sadd.s32 1, %s1191_s23   ;;  %s136_s26 = sadd.s32 1, %s1187_s22 }
   0x7   : > { %s133_s27 = ssub.s32 %s1191_s23, %s1252_s25  ;;  %p146_p0 = scmp.ne.s32.totalorder %s1187_s22, %s1183_s21 }
   0x8   : > { %p134_p1 = scmp.eq.s32.totalorder %s133_s27, 0  ;;  %p147_p2 = scmp.eq.s32.totalorder %s1248_s4, 1 }
   0x9   : > { %p152_p3 = scmp.ne.s32.totalorder %s1183_s21, %s1179_s20  ;;  %p153_p4 = scmp.eq.s32.totalorder %s900_s24, 1 }
   0xa   : > { %s1263_s28 = scalar_select %p134_p1, %s1187_s22, %s136_s26  }
   0xb   : > { %p1265_p5 = por %p147_p2, %p146_p0  ;;  %p1269_p6 = por %p153_p4, %p152_p3 }
   0xc   : > { %p903_p7 = scmp.ge.s32.totalorder %s1191_s23, 1  ;;  %p200_p8 = scmp.lt.s32.totalorder %s1191_s23, 3 }
   0xe   : > { %p201_p9 = pnand %p903_p7, %p200_p8 }
   0xf   : > { %s905_s12 = sshll.u32 (!%p201_p9), %s1248_s4, 5  ;;  %s229_s14 = sand.u32 (!%p201_p9), 1, %s1183_s21  }
  0x10   : > { %204 = sbr.rel (%p201_p9) target bundleno = 599 (0x257), region = 40  ;;  %p237_p10 = scmp.lt.s32.totalorder (!%p201_p9), %s905_s12, 47 }
  0x11   : > { %s904_s16 = sshll.u32 (!%p201_p9), %s229_s14, 1  ;;  %s1584_s18 = scalar_lea.sflag (!%p201_p9), [#allocation4], %s229_s14 }
  0x12   : > { %s231_s17 = scalar_lea.vmem (!%p201_p9), [#allocation3], %s904_s16 }
  0x15   : > { %v311_v0 = vld [vmem:[%s1640_s1 + $0x60] sm:$0xff]  ;;  %v313_v1 = vld [vmem:[%s1640_s1 + $0x70] sm:$0xff]  ;;  %v312_v2 = vld [vmem:[%s1640_s1 + $0x68] sm:$0xff]  ;;  %s1652_s12 = smov (!%p237_p10, %s905_s12), 47  ;;  %vm329_vm0 = vcmask 523264   ;;  %vm812_vm1 = vcmask 1040384  }
  0x16   : > { %v321_v3 = vpack.c.bf16 %v313_v1, %v311_v0  ;;  %v314_v4 = vld [vmem:[%s1640_s1 + $0x78] sm:$0xff]  ;;  %v307_v5 = vld [vmem:[%s1640_s1 + $0x40] sm:$0xff]  ;;  %v309_v6 = vld [vmem:[%s1640_s1 + $0x50] sm:$0xff]  ;;  %s906_s15 = sshll.u32 %s1652_s12, 3  ;;  %s940_s19 = sshll.u32 (%p1265_p5), %s1248_s4, 1 }
  0x17   : > { %v322_v7 = vpack.c.bf16 %v314_v4, %v312_v2  ;;  %v308_v8 = vld [vmem:[%s1640_s1 + $0x48] sm:$0xff]  ;;  %v310_v9 = vld [vmem:[%s1640_s1 + $0x58] sm:$0xff]  ;;  %v319_v10 = vpack.c.bf16 %v309_v6, %v307_v5  ;;  %v303_v12 = vld [vmem:[%s1640_s1 + $0x20] sm:$0xff]  ;;  %s1321_s27 = scalar_lea.vmem %s1639_s0, %s906_s15  ;;  %s749_s15 = sld [smem:[#allocation2]] }
  0x18   : > { %382 = vmatpush.bf16.msra.mxu0 %v321_v3  ;;  %944 = vmatpush.bf16.msra.mxu2 %v321_v3  ;;  %v320_v11 = vpack.c.bf16 %v310_v9, %v308_v8  ;;  %v305_v13 = vld [vmem:[%s1640_s1 + $0x30] sm:$0xff]  ;;  %v304_v14 = vld [vmem:[%s1640_s1 + $0x28] sm:$0xff]  ;;  %v306_v15 = vld [vmem:[%s1640_s1 + $0x38] sm:$0xff]  ;;  %s829_s24 = ssub.s32 (%p1265_p5), 3, %s940_s19 }
  0x19   : > { %471 = vmatpush.bf16.msra.mxu1 %v322_v7  ;;  %948 = vmatpush.bf16.msra.mxu3 %v322_v7  ;;  %v317_v16 = vpack.c.bf16 %v305_v13, %v303_v12  ;;  %v318_v17 = vpack.c.bf16 %v306_v15, %v304_v14  ;;  %v299_v18 = vld [vmem:[%s1640_s1] sm:$0xff]  ;;  %v301_v19 = vld [vmem:[%s1640_s1 + $0x10] sm:$0xff]  ;;  %v300_v20 = vld [vmem:[%s1640_s1 + $0x8] sm:$0xff]  ;;  %p830_p11 = scmp.lt.s32.totalorder (%p1265_p5), %s829_s24, 2 }
  0x1a   : > { %v302_v21 = vld [vmem:[%s1640_s1 + $0x18] sm:$0xff]  ;;  %v315_v22 = vpack.c.bf16 %v301_v19, %v299_v18  ;;  %v251_v23 = vld [vmem:[%s1321_s27] sm:$0xff]  ;;  %v252_v24 = vld [vmem:[%s1321_s27 + $0x8] sm:$0xff] }
  0x1b   : > { %v316_v25 = vpack.c.bf16 %v302_v21, %v300_v20  ;;  %v283_v26 = vpack.c.bf16 %v252_v24, %v251_v23  ;;  %v253_v27 = vld [vmem:[%s1321_s27 + $0x10] sm:$0xff]  ;;  %v254_v28 = vld [vmem:[%s1321_s27 + $0x18] sm:$0xff]  ;;  %v255_v30 = vld [vmem:[%s1321_s27 + $0x20] sm:$0xff] }
  0x1c   : > { %383 = vmatpush.bf16.msra.mxu0 %v319_v10  ;;  %945 = vmatpush.bf16.msra.mxu2 %v319_v10  ;;  %v284_v29 = vpack.c.bf16 %v254_v28, %v253_v27  ;;  %v256_v31 = vld [vmem:[%s1321_s27 + $0x28] sm:$0xff]  ;;  %v257_v33 = vld [vmem:[%s1321_s27 + $0x30] sm:$0xff]  ;;  %v258_v34 = vld [vmem:[%s1321_s27 + $0x38] sm:$0xff] }
  0x1d   : > { %472 = vmatpush.bf16.msra.mxu1 %v320_v11  ;;  %949 = vmatpush.bf16.msra.mxu3 %v320_v11  ;;  %v285_v32 = vpack.c.bf16 %v256_v31, %v255_v30  ;;  %v286_v35 = vpack.c.bf16 %v258_v34, %v257_v33  ;;  %v273_v36 = vld [vmem:[%s1321_s27 + $0xb0] sm:$0xff]  ;;  %v274_v37 = vld [vmem:[%s1321_s27 + $0xb8] sm:$0xff]  ;;  %v259_v39 = vld [vmem:[%s1321_s27 + $0x40] sm:$0xff] }
  0x1e   : > { %v1347_v38 = vpack.c.bf16 %v274_v37, %v273_v36  ;;  %v260_v40 = vld [vmem:[%s1321_s27 + $0x48] sm:$0xff]  ;;  %v275_v42 = vld [vmem:[%s1321_s27 + $0xc0] sm:$0xff]  ;;  %v261_v45 = vld [vmem:[%s1321_s27 + $0x50] sm:$0xff] }
  0x1f   : > { %v287_v41 = vpack.c.bf16 %v260_v40, %v259_v39  ;;  %v276_v43 = vld [vmem:[%s1321_s27 + $0xc8] sm:$0xff]  ;;  %v262_v46 = vld [vmem:[%s1321_s27 + $0x58] sm:$0xff]  ;;  %v277_v48 = vld [vmem:[%s1321_s27 + $0xd0] sm:$0xff] }
  0x20   : > { %384 = vmatpush.bf16.msra.mxu0 %v317_v16  ;;  %946 = vmatpush.bf16.msra.mxu2 %v317_v16  ;;  %v295_v44 = vpack.c.bf16 %v276_v43, %v275_v42  ;;  %v288_v47 = vpack.c.bf16 %v262_v46, %v261_v45  ;;  %v278_v49 = vld [vmem:[%s1321_s27 + $0xd8] sm:$0xff]  ;;  %v263_v51 = vld [vmem:[%s1321_s27 + $0x60] sm:$0xff]  ;;  %v264_v52 = vld [vmem:[%s1321_s27 + $0x68] sm:$0xff] }
  0x21   : > { %473 = vmatpush.bf16.msra.mxu1 %v318_v17  ;;  %950 = vmatpush.bf16.msra.mxu3 %v318_v17  ;;  %v296_v50 = vpack.c.bf16 %v278_v49, %v277_v48  ;;  %v289_v53 = vpack.c.bf16 %v264_v52, %v263_v51  ;;  %v265_v54 = vld [vmem:[%s1321_s27 + $0x70] sm:$0xff]  ;;  %v266_v55 = vld [vmem:[%s1321_s27 + $0x78] sm:$0xff]  ;;  %v279_v56 = vld [vmem:[%s1321_s27 + $0xe0] sm:$0xff] }
  0x22   : > { %v280_v57 = vld [vmem:[%s1321_s27 + $0xe8] sm:$0xff]  ;;  %v290_v58 = vpack.c.bf16 %v266_v55, %v265_v54  ;;  %v267_v60 = vld [vmem:[%s1321_s27 + $0x80] sm:$0xff]  ;;  %v281_v62 = vld [vmem:[%s1321_s27 + $0xf0] sm:$0xff] }
  0x23   : > { %v297_v59 = vpack.c.bf16 %v280_v57, %v279_v56  ;;  %v268_v61 = vld [vmem:[%s1321_s27 + $0x88] sm:$0xff]  ;;  %v282_v63 = vld [vmem:[%s1321_s27 + $0xf8] sm:$0xff]  ;;  %v323_v4 = vld [vmem:[%s1641_s2] sm:$0x3] }
  0x24   : > { %385 = vmatpush.bf16.msra.mxu0 %v315_v22  ;;  %947 = vmatpush.bf16.msra.mxu2 %v315_v22  ;;  %v291_v0 = vpack.c.bf16 %v268_v61, %v267_v60  ;;  %v298_v1 = vpack.c.bf16 %v282_v63, %v281_v62  ;;  %v1390_v5 = vperm.slane %v323_v4, 0  ;;  %v1392_v6 = vperm.slane %v323_v4, 1  ;;  %v269_v15 = vld [vmem:[%s1321_s27 + $0x90] sm:$0xff]  ;;  %v270_v16 = vld [vmem:[%s1321_s27 + $0x98] sm:$0xff]  ;;  %v271_v28 = vld [vmem:[%s1321_s27 + $0xa0] sm:$0xff] }
  0x25   : > { %474 = vmatpush.bf16.msra.mxu1 %v316_v25  ;;  %951 = vmatpush.bf16.msra.mxu3 %v316_v25  ;;  %v292_v17 = vpack.c.bf16 %v270_v16, %v269_v15 }
  0x27   : > { %907 = vmatmul.msk.bf16.vlgmr.msra.gmra.mxu0 %vm329_vm0, %v283_v26  ;;  %919 = vmatmul.msk.bf16.vlgmr.msra.gmra.mxu2 %vm329_vm0, %v295_v44 }
  0x28   : > { %923 = vmatmul.msk.bf16.vlgmr.msra.gmra.mxu1 %vm329_vm0, %v283_v26  ;;  %934 = vmatmul.msk.bf16.vlgmr.msra.gmra.mxu3 %vm329_vm0, %v1347_v38 }
  0x37   : > { %908 = vmatmul.msk.bf16.gmra.mxu0 %vm329_vm0, %v284_v29  ;;  %920 = vmatmul.msk.bf16.gmra.mxu2 %vm329_vm0, %v296_v50 }
  0x38   : > { %924 = vmatmul.msk.bf16.gmra.mxu1 %vm329_vm0, %v284_v29  ;;  %935 = vmatmul.msk.bf16.gmra.mxu3 %vm329_vm0, %v295_v44  ;;  %v272_v29 = vld [vmem:[%s1321_s27 + $0xa8] sm:$0xff] }
  0x39   : > { %v293_v30 = vpack.c.bf16 %v272_v29, %v271_v28 }
  0x47   : > { %909 = vmatmul.msk.bf16.gmra.mxu0 %vm329_vm0, %v285_v32  ;;  %921 = vmatmul.msk.bf16.gmra.mxu2 %vm329_vm0, %v297_v59 }
  0x48   : > { %925 = vmatmul.msk.bf16.gmra.mxu1 %vm329_vm0, %v285_v32  ;;  %936 = vmatmul.msk.bf16.gmra.mxu3 %vm329_vm0, %v296_v50 }
  0x57   : > { %910 = vmatmul.msk.bf16.gmra.mxu0 %vm329_vm0, %v286_v35  ;;  %922 = vmatmul.msk.bf16.gmra.mxu2 %vm329_vm0, %v298_v1 }
  0x58   : > { %926 = vmatmul.msk.bf16.gmra.mxu1 %vm329_vm0, %v286_v35  ;;  %937 = vmatmul.msk.bf16.gmra.mxu3 %vm329_vm0, %v297_v59 }
  0x67   : > { %911 = vmatmul.msk.bf16.gmra.mxu0 %vm329_vm0, %v287_v41 }
  0x68   : > { %927 = vmatmul.msk.bf16.gmra.mxu1 %vm329_vm0, %v287_v41  ;;  %938 = vmatmul.msk.bf16.gmra.mxu3 %vm329_vm0, %v298_v1 }
  0x77   : > { %912 = vmatmul.msk.bf16.gmra.mxu0 %vm329_vm0, %v288_v47 }
  0x78   : > { %928 = vmatmul.msk.bf16.gmra.mxu1 %vm329_vm0, %v288_v47 }
  0x87   : > { %913 = vmatmul.msk.bf16.gmra.mxu0 %vm329_vm0, %v289_v53 }
  0x88   : > { %929 = vmatmul.msk.bf16.gmra.mxu1 %vm329_vm0, %v289_v53 }
  0x97   : > { %914 = vmatmul.msk.bf16.gmra.mxu0 %vm329_vm0, %v290_v58 }
  0x98   : > { %930 = vmatmul.msk.bf16.gmra.mxu1 %vm329_vm0, %v290_v58 }
  0xa4   : > { %v387_v2 = vpop.f32.mrf.mxu0 }
  0xa5   : > { %v476_v3 = vpop.f32.mrf.mxu1  ;;  %v388_v8 = vadd.f32 %v387_v2, %v1390_v5 }
  0xa6   : > { %v477_v11 = vadd.f32 %v476_v3, %v1392_v6 }
  0xa7   : > { %915 = vmatmul.msk.bf16.gmra.mxu0 %vm329_vm0, %v291_v0 }
  0xa8   : > { %931 = vmatmul.msk.bf16.gmra.mxu1 %vm329_vm0, %v291_v0 }
  0xaa   : > { %v447_v4 = vpop.f32.mrf.mxu2 }
  0xab   : > { %v531_v54 = vpop.f32.mrf.mxu3 }
  0xac   : > { %v389_v7 = vpop.f32.mrf.mxu0  ;;  %v532_v61 = vadd.f32 %v531_v54, %v1392_v6 }
  0xad   : > { %v390_v9 = vadd.f32 %v389_v7, %v1390_v5  ;;  %v478_v10 = vpop.f32.mrf.mxu1 }
  0xae   : > { %v479_v12 = vadd.f32 %v478_v10, %v1392_v6  ;;  %v448_v10 = vadd.f32 %v447_v4, %v1390_v5 }
  0xaf   : > { %v1398_v13 = vpack.c.bf16 %v390_v9, %v388_v8 }
  0xb0   : > { %v1400_v14 = vpack.c.bf16 %v479_v12, %v477_v11 }
  0xb2   : > { %v449_v12 = vpop.f32.mrf.mxu2 }
  0xb3   : > { %v533_v63 = vpop.f32.mrf.mxu3  ;;  %v450_v16 = vadd.f32 %v449_v12, %v1390_v5 }
  0xb4   : > { %v392_v18 = vpop.f32.mrf.mxu0  ;;  %v534_v0 = vadd.f32 %v533_v63, %v1392_v6 }
  0xb5   : > { %v481_v19 = vpop.f32.mrf.mxu1  ;;  %v393_v21 = vadd.f32 %v392_v18, %v1390_v5  ;;  %v1452_v18 = vpack.c.bf16 %v450_v16, %v448_v10 }
  0xb6   : > { %v482_v24 = vadd.f32 %v481_v19, %v1392_v6  ;;  %v1446_v1 = vpack.c.bf16 %v534_v0, %v532_v61 }
  0xb7   : > { %916 = vmatmul.msk.bf16.gmra.mxu0 %vm329_vm0, %v292_v17 }
  0xb8   : > { %932 = vmatmul.msk.bf16.gmra.mxu1 %vm329_vm0, %v292_v17 }
  0xba   : > { %v1456_v28 = vpop.f32.mrf.mxu2 }
  0xbb   : > { %v536_v7 = vpop.f32.mrf.mxu3 }
  0xbc   : > { %v394_v20 = vpop.f32.mrf.mxu0  ;;  %v537_v11 = vadd.f32 %v536_v7, %v1392_v6 }
  0xbd   : > { %v395_v22 = vadd.f32 %v394_v20, %v1390_v5  ;;  %v483_v23 = vpop.f32.mrf.mxu1 }
  0xbe   : > { %v484_v25 = vadd.f32 %v483_v23, %v1392_v6 }
  0xbf   : > { %v1410_v26 = vpack.c.bf16 %v395_v22, %v393_v21 }
  0xc0   : > { %v1412_v27 = vpack.c.bf16 %v484_v25, %v482_v24 }
  0xc3   : > { %v538_v15 = vpop.f32.mrf.mxu3 }
  0xc4   : > { %v397_v31 = vpop.f32.mrf.mxu0  ;;  %v539_v17 = vadd.f32 %v538_v15, %v1392_v6 }
  0xc5   : > { %v486_v32 = vpop.f32.mrf.mxu1  ;;  %v398_v34 = vadd.f32 %v397_v31, %v1390_v5 }
  0xc6   : > { %v487_v37 = vadd.f32 %v486_v32, %v1392_v6  ;;  %v1454_v19 = vpack.c.bf16 %v539_v17, %v537_v11 }
  0xc7   : > { %917 = vmatmul.msk.bf16.gmra.mxu0 %vm329_vm0, %v293_v30 }
  0xc8   : > { %933 = vmatmul.msk.bf16.gmra.mxu1 %vm329_vm0, %v293_v30 }
  0xcb   : > { %v1458_v29 = vpop.f32.mrf.mxu3 }
  0xcc   : > { %v399_v33 = vpop.f32.mrf.mxu0 }
  0xcd   : > { %v400_v35 = vadd.f32 %v399_v33, %v1390_v5  ;;  %v488_v36 = vpop.f32.mrf.mxu1 }
  0xce   : > { %v489_v39 = vadd.f32 %v488_v36, %v1392_v6 }
  0xcf   : > { %v1422_v40 = vpack.c.bf16 %v400_v35, %v398_v34 }
  0xd0   : > { %v1424_v41 = vpack.c.bf16 %v489_v39, %v487_v37 }
  0xd3   : > { %v1470_v54 = vpop.f32.mrf.mxu3 }
  0xd4   : > { %v402_v42 = vpop.f32.mrf.mxu0 }
  0xd5   : > { %v491_v43 = vpop.f32.mrf.mxu1  ;;  %v403_v45 = vadd.f32 %v402_v42, %v1390_v5 }
  0xd6   : > { %v492_v48 = vadd.f32 %v491_v43, %v1392_v6 }
  0xd7   : > { %918 = vmatmul.msk.bf16.gmra.mxu0 %vm329_vm0, %v1347_v38 }
  0xdc   : > { %v404_v44 = vpop.f32.mrf.mxu0 }
  0xdd   : > { %v405_v46 = vadd.f32 %v404_v44, %v1390_v5  ;;  %v493_v47 = vpop.f32.mrf.mxu1 }
  0xde   : > { %v494_v49 = vadd.f32 %v493_v47, %v1392_v6 }
  0xdf   : > { %v1432_v50 = vpack.c.bf16 %v405_v46, %v403_v45 }
  0xe0   : > { %v1434_v51 = vpack.c.bf16 %v494_v49, %v492_v48 }
  0xe4   : > { %v407_v52 = vpop.f32.mrf.mxu0 }
  0xe5   : > { %v496_v53 = vpop.f32.mrf.mxu1  ;;  %v408_v38 = vadd.f32 %v407_v52, %v1390_v5 }
  0xe6   : > { %v497_v58 = vadd.f32 %v496_v53, %v1392_v6  ;;  %v1468_v53 = vpop.f32.mrf.mxu2 }
  0xec   : > { %v409_v55 = vpop.f32.mrf.mxu0 }
  0xed   : > { %v410_v56 = vadd.f32 %v409_v55, %v1390_v5  ;;  %v498_v57 = vpop.f32.mrf.mxu1 }
  0xee   : > { %v499_v59 = vadd.f32 %v498_v57, %v1392_v6 }
  0xef   : > { %v1440_v60 = vpack.c.bf16 %v410_v56, %v408_v38 }
  0xf0   : > { %v1443_v62 = vpack.c.bf16 %v499_v59, %v497_v58 }
  0xf4   : > { %v412_v2 = vpop.f32.mrf.mxu0 }
  0xf5   : > { %v501_v3 = vpop.f32.mrf.mxu1  ;;  %v413_v58 = vadd.f32 %v412_v2, %v1390_v5 }
  0xf6   : > { %v502_v4 = vadd.f32 %v501_v3, %v1392_v6 }
  0xfc   : > { %v414_v8 = vpop.f32.mrf.mxu0 }
  0xfd   : > { %v503_v9 = vpop.f32.mrf.mxu1  ;;  %v415_v38 = vadd.f32 %v414_v8, %v1390_v5 }
  0xfe   : > { %v504_v59 = vadd.f32 %v503_v9, %v1392_v6 }
  0xff   : > { %v567_v7 = vpack.c.bf16 %v415_v38, %v413_v58  ;;  %v603_v38 = vunpack.c.h.bf16 %v1432_v50  ;;  %v604_v58 = vunpack.c.h.bf16 %v1434_v51 }
 0x100   : > { %v568_v12 = vpack.c.bf16 %v504_v59, %v502_v4 }
 0x101   : > { %v609_v17 = vunpack.c.l.bf16 %v567_v7 }
 0x104   : > { %v417_v20 = vpop.f32.mrf.mxu0 }
 0x105   : > { %v506_v21 = vpop.f32.mrf.mxu1  ;;  %v418_v37 = vadd.f32 %v417_v20, %v1390_v5  ;;  %v1477_v20 = vpop.f32.mrf.mxu2 }
 0x106   : > { %v507_v44 = vadd.f32 %v506_v21, %v1392_v6  ;;  %v611_v21 = vunpack.c.h.bf16 %v567_v7 }
 0x10c   : > { %v419_v22 = vpop.f32.mrf.mxu0 }
 0x10d   : > { %v508_v23 = vpop.f32.mrf.mxu1  ;;  %v420_v31 = vadd.f32 %v419_v22, %v1390_v5  ;;  %v1480_v22 = vpop.f32.mrf.mxu3 }
 0x10e   : > { %v509_v39 = vadd.f32 %v508_v23, %v1392_v6 }
 0x10f   : > { %v569_v45 = vpack.c.bf16 %v420_v31, %v418_v37  ;;  %v612_v31 = vunpack.c.h.bf16 %v568_v12  ;;  %v607_v37 = vunpack.c.h.bf16 %v1440_v60 }
 0x110   : > { %v570_v52 = vpack.c.bf16 %v509_v39, %v507_v44 }
 0x111   : > { %v613_v56 = vunpack.c.l.bf16 %v569_v45  ;;  %v615_v57 = vunpack.c.h.bf16 %v569_v45  ;;  %v608_v45 = vunpack.c.h.bf16 %v1443_v62 }
 0x112   : > { %v614_v61 = vunpack.c.l.bf16 %v570_v52  ;;  %v616_v63 = vunpack.c.h.bf16 %v570_v52 }
 0x114   : > { %v422_v24 = vpop.f32.mrf.mxu0 }
 0x115   : > { %v511_v25 = vpop.f32.mrf.mxu1  ;;  %v423_v32 = vadd.f32 %v422_v24, %v1390_v5  ;;  %v610_v24 = vunpack.c.l.bf16 %v568_v12  ;;  %v599_v12 = vunpack.c.h.bf16 %v1422_v40 }
 0x116   : > { %v512_v35 = vadd.f32 %v511_v25, %v1392_v6 }
 0x11c   : > { %v424_v30 = vpop.f32.mrf.mxu0 }
 0x11d   : > { %v425_v33 = vadd.f32 %v424_v30, %v1390_v5  ;;  %v513_v34 = vpop.f32.mrf.mxu1 }
 0x11e   : > { %v514_v36 = vadd.f32 %v513_v34, %v1392_v6 }
 0x11f   : > { %v571_v42 = vpack.c.bf16 %v425_v33, %v423_v32 }
 0x120   : > { %v572_v43 = vpack.c.bf16 %v514_v36, %v512_v35  ;;  %v605_v35 = vunpack.c.l.bf16 %v1440_v60  ;;  %v601_v60 = vunpack.c.l.bf16 %v1432_v50  ;;  %v597_v50 = vunpack.c.l.bf16 %v1422_v40 }
 0x121   : > { %v617_v46 = vunpack.c.l.bf16 %v571_v42  ;;  %v619_v47 = vunpack.c.h.bf16 %v571_v42  ;;  %v606_v42 = vunpack.c.l.bf16 %v1443_v62  ;;  %v602_v62 = vunpack.c.l.bf16 %v1434_v51 }
 0x122   : > { %v618_v48 = vunpack.c.l.bf16 %v572_v43  ;;  %v620_v49 = vunpack.c.h.bf16 %v572_v43  ;;  %v1487_v43 = vpop.f32.mrf.mxu2 }
 0x123   : > { %990 = vtanh.f32 %v617_v46  ;;  %v1490_v46 = vpop.f32.mrf.mxu3 }
 0x124   : > { %992 = vtanh.f32 %v619_v47  ;;  %v427_v55 = vpop.f32.mrf.mxu0 }
 0x125   : > { %994 = vtanh.f32 %v618_v48  ;;  %v428_v15 = vadd.f32 %v427_v55, %v1390_v5 }
 0x126   : > { %996 = vtanh.f32 %v620_v49 }
 0x127   : > { %998 = vtanh.f32 %v613_v56 }
 0x128   : > { %1000 = vtanh.f32 %v615_v57 }
 0x129   : > { %v991_v0 = vpop.eup %990  ;;  %1002 = vtanh.f32 %v614_v61 }
 0x12a   : > { %v993_v10 = vpop.eup %992  ;;  %1004 = vtanh.f32 %v616_v63  ;;  %v462_v61 = vpop.f32.mrf.mxu2 }
 0x12b   : > { %v995_v11 = vpop.eup %994  ;;  %v731_v8 = vpack.c.bf16 %v993_v10, %v991_v0  ;;  %1006 = vtanh.f32 %v609_v17  ;;  %v551_v0 = vpop.f32.mrf.mxu3 }
 0x12c   : > { %v997_v16 = vpop.eup %996  ;;  %v429_v2 = vpop.f32.mrf.mxu0  ;;  %1008 = vtanh.f32 %v611_v21 }
 0x12d   : > { %757 = vmatpush.bf16.xpose.msrb.mxu2 %v731_v8  ;;  %v732_v9 = vpack.c.bf16 %v997_v16, %v995_v11  ;;  %v430_v3 = vadd.f32 %v429_v2, %v1390_v5  ;;  %v999_v23 = vpop.eup %998  ;;  %1010 = vtanh.f32 %v610_v24  ;;  %v1500_v10 = vpop.f32.mrf.mxu1  ;;  %v598_v8 = vunpack.c.l.bf16 %v1424_v41 }
 0x12e   : > { %v1001_v30 = vpop.eup %1000  ;;  %1012 = vtanh.f32 %v612_v31  ;;  %v600_v16 = vunpack.c.h.bf16 %v1424_v41  ;;  %v595_v31 = vunpack.c.h.bf16 %v1410_v26  ;;  %v463_v41 = vadd.f32 %v462_v61, %v1390_v5 }
 0x12f   : > { %770 = vmatpush.bf16.xpose.msrb.mxu3 %v732_v9  ;;  %v1482_v25 = vpack.c.bf16 %v430_v3, %v428_v15  ;;  %v1003_v32 = vpop.eup %1002  ;;  %v729_v34 = vpack.c.bf16 %v1001_v30, %v999_v23  ;;  %1014 = vtanh.f32 %v605_v35  ;;  %v593_v23 = vunpack.c.l.bf16 %v1410_v26 }
 0x130   : > { %v1005_v33 = vpop.eup %1004  ;;  %1016 = vtanh.f32 %v607_v37  ;;  %v552_v37 = vadd.f32 %v551_v0, %v1392_v6  ;;  %v589_v26 = vunpack.c.l.bf16 %v1398_v13 }
 0x131   : > { %v730_v36 = vpack.c.bf16 %v1005_v33, %v1003_v32  ;;  %v1007_v39 = vpop.eup %1006  ;;  %1018 = vtanh.f32 %v606_v42 }
 0x132   : > { %v1009_v44 = vpop.eup %1008  ;;  %1020 = vtanh.f32 %v608_v45  ;;  %v464_v3 = vpop.f32.mrf.mxu2 }
 0x133   : > { %v1011_v47 = vpop.eup %1010  ;;  %v727_v52 = vpack.c.bf16 %v1009_v44, %v1007_v39  ;;  %1022 = vtanh.f32 %v601_v60  ;;  %v553_v21 = vpop.f32.mrf.mxu3  ;;  %v465_v32 = vadd.f32 %v464_v3, %v1390_v5 }
 0x134   : > { %v1492_v48 = vpop.f32.mrf.mxu0  ;;  %v1013_v49 = vpop.eup %1012  ;;  %1024 = vtanh.f32 %v603_v38  ;;  %v554_v39 = vadd.f32 %v553_v21, %v1392_v6  ;;  %v458_v38 = vadd.f32 %v1477_v20, %v1390_v5  ;;  %v549_v20 = vadd.f32 %v1490_v46, %v1392_v6 }
 0x135   : > { %758 = vmatpush.bf16.xpose.msrb.mxu2 %v729_v34  ;;  %v728_v55 = vpack.c.bf16 %v1013_v49, %v1011_v47  ;;  %v1015_v56 = vpop.eup %1014  ;;  %1026 = vtanh.f32 %v602_v62  ;;  %v1509_v30 = vpop.f32.mrf.mxu1  ;;  %v594_v34 = vunpack.c.l.bf16 %v1412_v27  ;;  %v587_v45 = vpack.c.bf16 %v465_v32, %v463_v41 }
 0x136   : > { %v1017_v57 = vpop.eup %1016  ;;  %1028 = vtanh.f32 %v604_v58  ;;  %v591_v47 = vunpack.c.h.bf16 %v1398_v13  ;;  %v588_v60 = vpack.c.bf16 %v554_v39, %v552_v37  ;;  %v453_v46 = vadd.f32 %v1456_v28, %v1390_v5 }
 0x137   : > { %771 = vmatpush.bf16.xpose.msrb.mxu3 %v730_v36  ;;  %v1019_v59 = vpop.eup %1018  ;;  %v725_v4 = vpack.c.bf16 %v1017_v57, %v1015_v56  ;;  %1030 = vtanh.f32 %v597_v50  ;;  %v596_v36 = vunpack.c.h.bf16 %v1412_v27  ;;  %v592_v27 = vunpack.c.h.bf16 %v1400_v14 }
 0x138   : > { %v1021_v63 = vpop.eup %1020  ;;  %1032 = vtanh.f32 %v599_v12  ;;  %v460_v56 = vadd.f32 %v1487_v43, %v1390_v5  ;;  %v649_v62 = vunpack.c.l.bf16 %v587_v45  ;;  %v651_v13 = vunpack.c.h.bf16 %v587_v45 }
 0x139   : > { %v726_v11 = vpack.c.bf16 %v1021_v63, %v1019_v59  ;;  %v1023_v51 = vpop.eup %1022  ;;  %1034 = vtanh.f32 %v598_v8  ;;  %v650_v63 = vunpack.c.l.bf16 %v588_v60  ;;  %v652_v43 = vunpack.c.h.bf16 %v588_v60 }
 0x13a   : > { %v1025_v15 = vpop.eup %1024  ;;  %1036 = vtanh.f32 %v600_v16  ;;  %v585_v50 = vpack.c.bf16 %v460_v56, %v458_v38  ;;  %v455_v16 = vadd.f32 %v1468_v53, %v1390_v5  ;;  %v542_v21 = vadd.f32 %v1458_v29, %v1392_v6 }
 0x13b   : > { %v1027_v2 = vpop.eup %1026  ;;  %v723_v9 = vpack.c.bf16 %v1025_v15, %v1023_v51  ;;  %1038 = vtanh.f32 %v593_v23  ;;  %v544_v23 = vadd.f32 %v1470_v54, %v1392_v6  ;;  %v637_v56 = vunpack.c.l.bf16 %v1452_v18 }
 0x13c   : > { %v1498_v7 = vpop.f32.mrf.mxu0  ;;  %v1029_v17 = vpop.eup %1028  ;;  %1040 = vtanh.f32 %v595_v31 }
 0x13d   : > { %759 = vmatpush.bf16.xpose.msrb.mxu2 %v727_v52  ;;  %v724_v40 = vpack.c.bf16 %v1029_v17, %v1027_v2  ;;  %v1031_v33 = vpop.eup %1030  ;;  %1042 = vtanh.f32 %v594_v34  ;;  %v590_v52 = vunpack.c.l.bf16 %v1400_v14  ;;  %v1528_v59 = vpop.f32.mrf.mxu1  ;;  %v547_v14 = vadd.f32 %v1480_v22, %v1392_v6 }
 0x13e   : > { %v1033_v35 = vpop.eup %1032  ;;  %1044 = vtanh.f32 %v596_v36  ;;  %v645_v2 = vunpack.c.l.bf16 %v585_v50  ;;  %v583_v34 = vpack.c.bf16 %v455_v16, %v453_v46  ;;  %v584_v36 = vpack.c.bf16 %v544_v23, %v542_v21 }
 0x13f   : > { %772 = vmatpush.bf16.xpose.msrb.mxu3 %v728_v55  ;;  %v1035_v42 = vpop.eup %1034  ;;  %v721_v49 = vpack.c.bf16 %v1033_v35, %v1031_v33  ;;  %1046 = vtanh.f32 %v589_v26  ;;  %v586_v51 = vpack.c.bf16 %v549_v20, %v547_v14  ;;  %v639_v20 = vunpack.c.h.bf16 %v1452_v18 }
 0x140   : > { %v1037_v44 = vpop.eup %1036  ;;  %1048 = vtanh.f32 %v591_v47  ;;  %v641_v39 = vunpack.c.l.bf16 %v583_v34  ;;  %v642_v45 = vunpack.c.l.bf16 %v584_v36  ;;  %v636_v21 = vunpack.c.h.bf16 %v1446_v1 }
 0x141   : > { %v722_v55 = vpack.c.bf16 %v1037_v44, %v1035_v42  ;;  %v1039_v57 = vpop.eup %1038  ;;  %1050 = vtanh.f32 %v590_v52  ;;  %v648_v41 = vunpack.c.h.bf16 %v586_v51  ;;  %v556_v42 = vld [vmem:[%s1642_s3] sm:$0x3]  ;;  %v643_v44 = vunpack.c.h.bf16 %v583_v34 }
 0x142   : > { %v1041_v61 = vpop.eup %1040  ;;  %1052 = vtanh.f32 %v592_v27  ;;  %752 = vst [vmem:[#allocation1] ss:$9 sm:$0xff] %v556_v42 }
 0x143   : > { %v1043_v0 = vpop.eup %1042  ;;  %1054 = vtanh.f32 %v649_v62 }
 0x144   : > { %v1507_v24 = vpop.f32.mrf.mxu0  ;;  %1056 = vtanh.f32 %v651_v13 }
 0x145   : > { %760 = vmatpush.bf16.xpose.msrb.mxu2 %v725_v4  ;;  %v1045_v4 = vpop.eup %1044  ;;  %1058 = vtanh.f32 %v650_v63  ;;  %v1542_v33 = vpop.f32.mrf.mxu1 }
 0x146   : > { %v1047_v12 = vpop.eup %1046  ;;  %1060 = vtanh.f32 %v652_v43  ;;  %v720_v15 = vpack.c.bf16 %v1045_v4, %v1043_v0  ;;  %v638_v0 = vunpack.c.l.bf16 %v1454_v19  ;;  %v640_v4 = vunpack.c.h.bf16 %v1454_v19 }
 0x147   : > { %773 = vmatpush.bf16.xpose.msrb.mxu3 %v726_v11  ;;  %v719_v11 = vpack.c.bf16 %v1041_v61, %v1039_v57  ;;  %v1049_v8 = vpop.eup %1048  ;;  %1062 = vtanh.f32 %v645_v2  ;;  %v634_v2 = vunpack.c.l.bf16 %v1446_v1 }
 0x148   : > { %v1051_v22 = vpop.eup %1050  ;;  %v717_v35 = vpack.c.bf16 %v1049_v8, %v1047_v12  ;;  %v438_v8 = vadd.f32 %v1507_v24, %v1390_v5 }
 0x149   : > { %v1053_v17 = vpop.eup %1052  ;;  %v1550_v61 = vld [vmem:[#allocation1] sm:$0xff]  ;;  %v1552_v14 = vld [vmem:[#allocation1 + $0x9] sm:$0xff] }
 0x14a   : > { %v1055_v3 = vpop.eup %1054  ;;  %v718_v29 = vpack.c.bf16 %v1053_v17, %v1051_v22 }
 0x14b   : > { %v1057_v31 = vpop.eup %1056 }
 0x14c   : > { %v1526_v58 = vpop.f32.mrf.mxu0  ;;  %v1059_v28 = vpop.eup %1058  ;;  %v747_v37 = vpack.c.bf16 %v1057_v31, %v1055_v3 }
 0x14d   : > { %761 = vmatpush.bf16.xpose.msrb.mxu2 %v723_v9  ;;  %v647_v9 = vunpack.c.h.bf16 %v585_v50  ;;  %v1061_v53 = vpop.eup %1060 }
 0x14e   : > { %v748_v54 = vpack.c.bf16 %v1061_v53, %v1059_v28  ;;  %v1063_v26 = vpop.eup %1062 }
 0x14f   : > { %774 = vmatpush.bf16.xpose.msrb.mxu3 %v724_v40  ;;  %v646_v40 = vunpack.c.l.bf16 %v586_v51  ;;  %1064 = vtanh.f32 %v647_v9 }
 0x151   : > { %1066 = vtanh.f32 %v646_v40 }
 0x152   : > { %1068 = vtanh.f32 %v648_v41  ;;  %v433_v41 = vadd.f32 %v1492_v48, %v1390_v5 }
 0x153   : > { %1070 = vtanh.f32 %v641_v39 }
 0x154   : > { %v442_v32 = vpop.f32.mrf.mxu0  ;;  %1072 = vtanh.f32 %v643_v44 }
 0x155   : > { %762 = vmatpush.bf16.xpose.msrb.mxu2 %v721_v49  ;;  %v1065_v47 = vpop.eup %1064  ;;  %v644_v49 = vunpack.c.h.bf16 %v584_v36  ;;  %1074 = vtanh.f32 %v642_v45  ;;  %v443_v62 = vadd.f32 %v442_v32, %v1390_v5  ;;  %v435_v32 = vadd.f32 %v1498_v7, %v1390_v5 }
 0x156   : > { %v745_v38 = vpack.c.bf16 %v1065_v47, %v1063_v26  ;;  %v524_v36 = vadd.f32 %v1542_v33, %v1392_v6  ;;  %v517_v33 = vadd.f32 %v1500_v10, %v1392_v6  ;;  %v519_v47 = vadd.f32 %v1509_v30, %v1392_v6 }
 0x157   : > { %775 = vmatpush.bf16.xpose.msrb.mxu3 %v722_v55  ;;  %v1067_v52 = vpop.eup %1066  ;;  %v526_v55 = vpop.f32.mrf.mxu1  ;;  %1076 = vtanh.f32 %v644_v49  ;;  %v575_v48 = vpack.c.bf16 %v435_v32, %v433_v41  ;;  %v623_v10 = vunpack.c.h.bf16 %v1482_v25 }
 0x158   : > { %v1069_v60 = vpop.eup %1068  ;;  %1078 = vtanh.f32 %v637_v56  ;;  %v527_v17 = vadd.f32 %v526_v55, %v1392_v6 }
 0x159   : > { %v746_v13 = vpack.c.bf16 %v1069_v60, %v1067_v52  ;;  %v1071_v63 = vpop.eup %1070  ;;  %1080 = vtanh.f32 %v639_v20  ;;  %v625_v44 = vunpack.c.l.bf16 %v575_v48 }
 0x15a   : > { %v1073_v43 = vpop.eup %1072  ;;  %1082 = vtanh.f32 %v638_v0 }
 0x15b   : > { %v1075_v50 = vpop.eup %1074  ;;  %v743_v51 = vpack.c.bf16 %v1073_v43, %v1071_v63  ;;  %1084 = vtanh.f32 %v640_v4 }
 0x15c   : > { %v444_v27 = vpop.f32.mrf.mxu0 }
 0x15d   : > { %763 = vmatpush.bf16.xpose.msrb.mxu2 %v719_v11  ;;  %v445_v57 = vadd.f32 %v444_v27, %v1390_v5  ;;  %v1077_v12 = vpop.eup %1076 }
 0x15e   : > { %v744_v46 = vpack.c.bf16 %v1077_v12, %v1075_v50  ;;  %v1079_v19 = vpop.eup %1078 }
 0x15f   : > { %776 = vmatpush.bf16.xpose.msrb.mxu3 %v720_v15  ;;  %v579_v11 = vpack.c.bf16 %v445_v57, %v443_v62  ;;  %v528_v18 = vpop.f32.mrf.mxu1  ;;  %v440_v15 = vadd.f32 %v1526_v58, %v1390_v5  ;;  %v1081_v3 = vpop.eup %1080  ;;  %v621_v62 = vunpack.c.l.bf16 %v1482_v25 }
 0x160   : > { %v529_v9 = vadd.f32 %v528_v18, %v1392_v6  ;;  %v1083_v23 = vpop.eup %1082  ;;  %v741_v31 = vpack.c.bf16 %v1081_v3, %v1079_v19 }
 0x161   : > { %v633_v22 = vunpack.c.l.bf16 %v579_v11  ;;  %v635_v16 = vunpack.c.h.bf16 %v579_v11  ;;  %v577_v24 = vpack.c.bf16 %v440_v15, %v438_v8  ;;  %v1085_v40 = vpop.eup %1084 }
 0x162   : > { %v578_v58 = vpack.c.bf16 %v529_v9, %v527_v17  ;;  %v742_v34 = vpack.c.bf16 %v1085_v40, %v1083_v23  ;;  %v815_v9 = vlaneseq }
 0x163   : > { %1086 = vtanh.f32 %v633_v22  ;;  %v629_v28 = vunpack.c.l.bf16 %v577_v24  ;;  %v631_v53 = vunpack.c.h.bf16 %v577_v24 }
 0x164   : > { %1088 = vtanh.f32 %v635_v16  ;;  %v632_v39 = vunpack.c.h.bf16 %v578_v58  ;;  %v750_v16 = vstv %s749_s15  ;;  %vm817_vm2 = vcmp.lt.s32.totalorder %v815_v9, 256 }
 0x165   : > { %764 = vmatpush.bf16.xpose.msrb.mxu2 %v717_v35  ;;  %1090 = vtanh.f32 %v634_v2  ;;  %v522_v35 = vadd.f32 %v1528_v59, %v1392_v6  ;;  %v627_v59 = vunpack.c.h.bf16 %v575_v48 }
 0x166   : > { %1092 = vtanh.f32 %v636_v21 }
 0x167   : > { %777 = vmatpush.bf16.xpose.msrb.mxu3 %v718_v29  ;;  %1094 = vtanh.f32 %v629_v28  ;;  %v576_v5 = vpack.c.bf16 %v524_v36, %v522_v35 }
 0x168   : > { %1096 = vtanh.f32 %v631_v53 }
 0x169   : > { %v1087_v1 = vpop.eup %1086  ;;  %v626_v49 = vunpack.c.l.bf16 %v576_v5  ;;  %v628_v60 = vunpack.c.h.bf16 %v576_v5 }
 0x16a   : > { %v1089_v29 = vpop.eup %1088 }
 0x16b   : > { %v739_v7 = vpack.c.bf16 %v1089_v29, %v1087_v1 }
 0x16c   : > { %765 = vmatmul.bf16.vlgmr.msrb.gmra.mxu2 %v1550_v61 }
 0x16d   : > { %783 = vmatpush.bf16.xpose.msra.mxu2 %v747_v37  ;;  %v630_v37 = vunpack.c.l.bf16 %v578_v58 }
 0x16e   : > { %778 = vmatmul.bf16.vlgmr.msrb.gmra.mxu3 %v1552_v14 }
 0x16f   : > { %796 = vmatpush.bf16.xpose.msra.mxu3 %v748_v54  ;;  %v1091_v54 = vpop.eup %1090  ;;  %1098 = vtanh.f32 %v630_v37 }
 0x170   : > { %v1093_v42 = vpop.eup %1092  ;;  %1100 = vtanh.f32 %v632_v39 }
 0x171   : > { %v740_v26 = vpack.c.bf16 %v1093_v42, %v1091_v54  ;;  %v1095_v45 = vpop.eup %1094  ;;  %1102 = vtanh.f32 %v625_v44 }
 0x172   : > { %v1097_v52 = vpop.eup %1096  ;;  %1104 = vtanh.f32 %v627_v59 }
 0x173   : > { %1106 = vtanh.f32 %v626_v49  ;;  %v737_v56 = vpack.c.bf16 %v1097_v52, %v1095_v45 }
 0x174   : > { %1108 = vtanh.f32 %v628_v60 }
 0x175   : > { %784 = vmatpush.bf16.xpose.msra.mxu2 %v745_v38  ;;  %v1099_v27 = vpop.eup %1098  ;;  %v574_v38 = vpack.c.bf16 %v519_v47, %v517_v33  ;;  %1110 = vtanh.f32 %v621_v62 }
 0x176   : > { %v1101_v55 = vpop.eup %1100  ;;  %1112 = vtanh.f32 %v623_v10 }
 0x177   : > { %797 = vmatpush.bf16.xpose.msra.mxu3 %v746_v13  ;;  %v738_v57 = vpack.c.bf16 %v1101_v55, %v1099_v27  ;;  %v1103_v13 = vpop.eup %1102  ;;  %v622_v6 = vunpack.c.l.bf16 %v574_v38  ;;  %v624_v20 = vunpack.c.h.bf16 %v574_v38 }
 0x178   : > { %v1105_v30 = vpop.eup %1104 }
 0x179   : > { %v1107_v63 = vpop.eup %1106  ;;  %1114 = vtanh.f32 %v622_v6  ;;  %v735_v43 = vpack.c.bf16 %v1105_v30, %v1103_v13 }
 0x17a   : > { %v1109_v0 = vpop.eup %1108  ;;  %1116 = vtanh.f32 %v624_v20 }
 0x17b   : > { %v736_v4 = vpack.c.bf16 %v1109_v0, %v1107_v63  ;;  %v1111_v50 = vpop.eup %1110 }
 0x17c   : > { %v1113_v11 = vpop.eup %1112 }
 0x17d   : > { %785 = vmatpush.bf16.xpose.msra.mxu2 %v743_v51  ;;  %v733_v51 = vpack.c.bf16 %v1113_v11, %v1111_v50 }
 0x17f   : > { %798 = vmatpush.bf16.xpose.msra.mxu3 %v744_v46  ;;  %v1115_v12 = vpop.eup %1114 }
 0x180   : > { %v1117_v25 = vpop.eup %1116 }
 0x181   : > { %v734_v18 = vpack.c.bf16 %v1117_v25, %v1115_v12 }
 0x185   : > { %786 = vmatpush.bf16.xpose.msra.mxu2 %v741_v31 }
 0x187   : > { %799 = vmatpush.bf16.xpose.msra.mxu3 %v742_v34 }
 0x18d   : > { %787 = vmatpush.bf16.xpose.msra.mxu2 %v739_v7 }
 0x18f   : > { %800 = vmatpush.bf16.xpose.msra.mxu3 %v740_v26 }
 0x195   : > { %788 = vmatpush.bf16.xpose.msra.mxu2 %v737_v56 }
 0x197   : > { %801 = vmatpush.bf16.xpose.msra.mxu3 %v738_v57 }
 0x19d   : > { %789 = vmatpush.bf16.xpose.msra.mxu2 %v735_v43 }
 0x19f   : > { %802 = vmatpush.bf16.xpose.msra.mxu3 %v736_v4 }
 0x1a5   : > { %790 = vmatpush.bf16.xpose.msra.mxu2 %v733_v51 }
 0x1a7   : > { %803 = vmatpush.bf16.xpose.msra.mxu3 %v734_v18 }
 0x1ac   : > { %791 = vmatmul.bf16.vlgmr.msra.gmra.mxu2 %v1550_v61 }
 0x1ae   : > { %804 = vmatmul.bf16.vlgmr.msra.gmra.mxu3 %v1552_v14 }
 0x1ef   : > { %v766_v8 = vpop.f32.mrf.mxu2 }
 0x1f0   : > { %v767_v2 = vadd.f32 %v766_v8, %v750_v16 }
 0x1f1   : > { %v779_v15 = vpop.f32.mrf.mxu3 }
 0x1f2   : > { %v780_v23 = vadd.f32 %v779_v15, %v767_v2 }
 0x1f7   : > { %v768_v22 = vpop.f32.mrf.mxu2 }
 0x1f9   : > { %v781_v46 = vpop.f32.mrf.mxu3 }
 0x22f   : > { %v792_v19 = vpop.f32.mrf.mxu2 }
 0x230   : > { %v793_v17 = vadd.f32 %v792_v19, %v750_v16 }
 0x231   : > { %v805_v3 = vpop.f32.mrf.mxu3 }
 0x232   : > { %v806_v21 = vadd.f32 %v805_v3, %v793_v17 }
 0x234   : > { %v811_v24 = vrot.slane %v806_v21, 7 }
 0x235   : > { %827 = sbr.rel (!%p1265_p5) target bundleno = 599 (0x257), region = 44 }
 0x236   : > { %v813_v61 = vsel %vm812_vm1, %v780_v23, %v811_v24 }
 0x237   : > { %819 = vst.msk [vmem:[%s231_s17] sm:$0x3] %vm817_vm2, %v813_v61  ;;  %v794_v14 = vpop.f32.mrf.mxu2 }
 0x239   : > { %v807_v40 = vpop.f32.mrf.mxu3 }
 0x23a   : > { %s1654_s24 = smov (!%p830_p11, %s829_s24), 2 }
 0x23b   : > { %s832_s26 = ssub.s32 2, %s1654_s24 }
 0x23c   : > { %s833_s27 = sshll.u32 %s832_s26, 4 }
 0x23d   : > { %834 = vsyncadd %s1584_s18, %s833_s27  ;;  %p941_p12 = scmp.ne.s32.totalorder %s1654_s24, 0  ;;  %s836_s29 = scalar_lea.hbm %s1644_s5, %s940_s19 }
 0x23e   : > { %s837_s7 = sshll.u32 %s1654_s24, 4  ;;  %s1598_s8 = sshll.u32 %s231_s17, 4  ;;  %s839_s8 = int_to_ptr.vmem [resolvable:$true] %s1598_s8 }
 0x23f   : > { %s840_s4 = sshll.u32 %s836_s29, 4  ;;  %s1118_s9 = sshra.s32 %s839_s8, 4  ;;  %s841_s4 = int_to_ptr.hbm [resolvable:$true] %s840_s4  ;;  %s1119_s9 = int_to_ptr.vmem [resolvable:$true] %s1118_s9 }
 0x240   : > { %s1120_s10 = sshrl.u32 %s837_s7, 4  ;;  %s1193_s13 = smov [#allocation3]  }
 0x241   : > { %s1125_s11 = scalar_lea.vmem %s1119_s9, %s1120_s10  ;;  %s1129_s14 = scalar_lea.vmem %s1193_s13, 4 }
 0x242   : > { %p1126_p13 = scmp.ne.s32.totalorder %s1119_s9, %s1125_s11  ;;  %p1131_p2 = scmp.lt.s32.totalorder %s1129_s14, %s1125_s11 }
 0x244   : > { %p1127_p0 = pnand %p1126_p13, %p941_p12 }
 0x246   : > { %p1128_p1 = pneg %p1127_p0 }
 0x248   : > { %p1133_p3 = pnand %p1131_p2, %p1128_p1 }
 0x24a   : > { %1136 = shalt.err (!%p1133_p3)
}
 0x24b   : > { %s1137_s15 = sshra.s32 %s841_s4, 4  ;;  %s1148_s26 = scalar_lea.hbm %s1644_s5, 3  ;;  %s1138_s15 = int_to_ptr.hbm [resolvable:$true] %s1137_s15 }
 0x24c   : > { %s1144_s16 = scalar_lea.hbm %s1138_s15, %s1120_s10  ;;  %p1149_p8 = scmp.lt.s32.totalorder %s1138_s15, %s1644_s5 }
 0x24d   : > { %p1145_p4 = scmp.ne.s32.totalorder %s1138_s15, %s1144_s16  ;;  %p1150_p9 = scmp.lt.s32.totalorder %s1148_s26, %s1144_s16 }
 0x24f   : > { %p1146_p5 = pnand %p1145_p4, %p941_p12  ;;  %p1151_p10 = por %p1150_p9, %p1149_p8 }
 0x251   : > { %p1147_p7 = pneg %p1146_p5 }
 0x253   : > { %p1152_p11 = pnand %p1151_p10, %p1147_p7 }
 0x255   : > { %1155 = shalt.err (!%p1152_p11)
}
 0x256   : > { %843 = dma.vmem_to_hbm [thread:$0]  (%p941_p12), %s839_s8, %s837_s7, %s841_s4, %s1584_s18  }
 0x257 PF: > { %p957_p13 = scmp.ge.s32.totalorder %s1191_s23, 2  ;;  %s852_s6 = sand.u32 1, %s1179_s20  }
 0x258   : > { %s853_s29 = scalar_lea.sflag [#allocation4], %s852_s6 }
 0x259   : > { %p954_p0 = pnand %p957_p13, %p1269_p6 }
 0x25b   : > { %p955_p1 = pneg %p954_p0 }
 0x25d   : > { %1174 = dma.done.wait (%p955_p1), %s853_s29, 32  }
 0x25e   : > { %1176 = vsyncadd (%p955_p1), %s853_s29, 4294967264  ;;  %p16_p2 = scmp.ge.s32.totalorder %s1252_s25, 4   ;;  %s1647_s20 = smov %s1183_s21 }
 0x25f   : > { %s1648_s21 = smov %s1187_s22  ;;  %s1649_s22 = smov %s1263_s28 }
 0x260   : > { %s1650_s23 = smov %s1252_s25  ;;  %18 = sbr.rel (!%p16_p2) target bundleno = 5 (0x5), region = 75 }
 0x265   :  { %859 = vsyncpa [#allocation4], 1 }
 0x266   :  { %861 = vsyncpa [#allocation4 + $0x1], 1 }

</bundles_post_ra>
